<compile_context>
chip_gen: v7x
topology: tpu7x:2x2x1
jax: 0.10.0
libtpu: 0.0.40
codegen_flags: <defaults>
</compile_context>

<pallas_src>
import jax
import jax.numpy as jnp
from jax.experimental import pallas as pl
from jax.experimental.pallas import tpu as pltpu

WIDTH = 8
HEIGHT = 8
IN_DIM = WIDTH * HEIGHT   # 64
HID = 256
OUT_DIM = 1
MAX_TB = 1024             # largest batch tile (M dim of the MXU matmuls)


def _round_up(n, m):
    return ((n + m - 1) // m) * m


def _cdiv(a, b):
    return (a + b - 1) // b


def _pick_tb(batch):
    """Pick the batch tile.  Lane-dense output wants TB % 128 == 0; small
    batches collapse to a single grid step; otherwise prefer an even number of
    tiles so v7x's two TensorCores share the 'parallel' batch axis evenly."""
    bp = _round_up(batch, 128)
    if bp <= 256:
        return bp
    for tb in (1024, 512, 256, 128):
        if 2 * tb <= bp and _cdiv(bp, tb) % 2 == 0:
            return tb
    return min(bp, MAX_TB)


def neuro_kernel(x_ref, w1_ref, b1_ref, w2_ref, b2_ref, w3_ref, b3_ref, o_ref):
    # x is the raw 0/1 board (bf16); checkScore's -0.5 shift is folded into b1.
    x = x_ref[...]                                                   # (TB, 64) bf16

    # fc1 + relu: single-pass bf16 MXU matmul, f32 accumulate / epilogue
    h1 = jnp.dot(x, w1_ref[...], preferred_element_type=jnp.float32)
    h1 = jnp.maximum(h1 + b1_ref[...], 0.0)                          # (TB, 256) f32

    # fc2 + relu
    h2 = jnp.dot(h1.astype(jnp.bfloat16), w2_ref[...],
                 preferred_element_type=jnp.float32)
    h2 = jnp.maximum(h2 + b2_ref[...], 0.0)                          # (TB, 256) f32

    # fc3 (N=1): VPU broadcast-mul + XLU lane reduction (keeps the MXU free),
    # then one XLU relayout to a lane-dense (1, TB) row for an unmasked store.
    o = jnp.sum(h2 * w3_ref[...], axis=-1, keepdims=True)            # (TB, 1) f32
    o_ref[...] = jnp.transpose(o + b3_ref[0, 0])                     # (1, TB)


@jax.jit
def neuro_forward(states, params):
    """states: (B, HEIGHT, WIDTH) 0/1 float grids. Returns (B, 1) f32 scores."""
    w1, b1, w2, b2, w3, b3 = params
    B = states.shape[0]

    # Fold checkScore's constant -0.5 into fc1's bias (kernel gets raw boards).
    b1_fold = (b1 - 0.5 * jnp.sum(w1, axis=0, keepdims=True)).astype(jnp.float32)

    x = states.reshape(B, IN_DIM).astype(jnp.bfloat16)       # bf16 MXU operand (0/1 exact)
    w1_bf = w1.astype(jnp.bfloat16)
    w2_bf = w2.astype(jnp.bfloat16)
    w3_row = w3.reshape(1, HID).astype(jnp.float32)          # f32 epilogue weight

    TB = _pick_tb(B)
    n_tiles = _cdiv(B, TB)            # ragged tail handled by partial blocks

    weight_bytes = 2 * (IN_DIM * HID + HID * HID) + 4 * (3 * HID + 1)
    cost = pl.CostEstimate(
        flops=2 * n_tiles * TB * (IN_DIM * HID + HID * HID + HID),
        transcendentals=0,
        bytes_accessed=weight_bytes + 2 * n_tiles * TB * IN_DIM + 4 * n_tiles * TB,
    )

    const = lambda i: (0, 0)   # same block every grid step => weights stay VMEM-resident
    out = pl.pallas_call(
        neuro_kernel,
        out_shape=jax.ShapeDtypeStruct((n_tiles, 1, TB), jnp.float32),
        grid_spec=pltpu.PrefetchScalarGridSpec(
            num_scalar_prefetch=0,
            grid=(n_tiles,),
            in_specs=[
                pl.BlockSpec((TB, IN_DIM), lambda i: (i, 0)),        # x: streams per batch tile
                pl.BlockSpec((IN_DIM, HID), const),                  # w1 (resident, bf16)
                pl.BlockSpec((1, HID), const),                       # b1 (folded, f32)
                pl.BlockSpec((HID, HID), const),                     # w2 (resident, bf16)
                pl.BlockSpec((1, HID), const),                       # b2 (f32)
                pl.BlockSpec((1, HID), const),                       # w3 row (f32)
                pl.BlockSpec(memory_space=pltpu.MemorySpace.SMEM),   # b3 scalar
            ],
            # Lane-dense output rows; leading tile dim squeezed out of the ref.
            out_specs=pl.BlockSpec((None, 1, TB), lambda i: (i, 0, 0)),
        ),
        compiler_params=pltpu.CompilerParams(
            dimension_semantics=("parallel",),   # batch tiles shard across TCs on v7x
        ),
        cost_estimate=cost,
    )(x, w1_bf, b1_fold, w2_bf, b2, w3_row, b3)

    # (n_tiles, 1, TB) lane-dense -> flat batch order -> (B, 1); drop ragged tail.
    return out.reshape(-1, OUT_DIM)[:B]


def init_params(key):
    """Deterministic init matching nn.Linear default: U(-1/sqrt(fan_in), +1/sqrt(fan_in))."""
    ks = jax.random.split(key, 6)

    def lin(kw, kb, fan_in, fan_out):
        bound = 1.0 / jnp.sqrt(jnp.float32(fan_in))
        w = jax.random.uniform(kw, (fan_in, fan_out), jnp.float32, -bound, bound)
        b = jax.random.uniform(kb, (1, fan_out), jnp.float32, -bound, bound)
        return w, b

    w1, b1 = lin(ks[0], ks[1], IN_DIM, HID)
    w2, b2 = lin(ks[2], ks[3], HID, HID)
    w3, b3 = lin(ks[4], ks[5], HID, OUT_DIM)
    return (w1, b1, w2, b2, w3, b3)


def neuro_reference(states, params, bf16_matched):
    """Pure-JAX reference for Neuro.forward (per board).  bf16_matched=True
    mirrors the kernel's quantization (bf16 MXU operands, fc1 bias fold)."""
    w1, b1, w2, b2, w3, b3 = params
    B = states.shape[0]
    x = states.reshape(B, IN_DIM).astype(jnp.float32)
    if bf16_matched:
        c = lambda a: a.astype(jnp.bfloat16).astype(jnp.float32)
        b1f = b1 - 0.5 * jnp.sum(w1, axis=0, keepdims=True)
        h = jnp.maximum(c(x) @ c(w1) + b1f, 0.0)
        h = jnp.maximum(c(h) @ c(w2) + b2, 0.0)
        return h @ w3 + b3
    x = x - 0.5
    h = jnp.maximum(x @ w1 + b1, 0.0)
    h = jnp.maximum(h @ w2 + b2, 0.0)
    return h @ w3 + b3


if __name__ == "__main__":
    key = jax.random.PRNGKey(0)
    k_params, k_state = jax.random.split(key)
    params = init_params(k_params)

    # B=256 exercises the single-tile path; B=1024 exercises TB=512 x 2 tiles
    # (resident weights across grid steps, parallel batch axis).
    for B in (256, 1024):
        ks = jax.random.fold_in(k_state, B)
        states = jax.random.bernoulli(ks, 0.5, (B, HEIGHT, WIDTH)).astype(jnp.float32)

        out = neuro_forward(states, params)
        jax.block_until_ready(out)
        assert out.shape == (B, OUT_DIM)

        # Tight check against a reference with the kernel's exact quantization.
        ref_q = neuro_reference(states, params, bf16_matched=True)
        assert jnp.allclose(out, ref_q, atol=2e-3, rtol=1e-2), (B, out[:4], ref_q[:4])

        # Loose drift check against the original full-f32 semantics.
        ref_f = neuro_reference(states, params, bf16_matched=False)
        assert jnp.allclose(out, ref_f, atol=1e-2, rtol=5e-2), (B, out[:4], ref_f[:4])

    print("KERNEL_OK")
</pallas_src>

<mosaic_0001>
module attributes {stable_mosaic.version = 11 : i64} {
  func.func @neuro_kernel(%arg0: i32, %arg1: memref<256x64xbf16, #tpu.memory_space<vmem>>, %arg2: memref<64x256xbf16, #tpu.memory_space<vmem>>, %arg3: memref<1x256xf32, #tpu.memory_space<vmem>>, %arg4: memref<256x256xbf16, #tpu.memory_space<vmem>>, %arg5: memref<1x256xf32, #tpu.memory_space<vmem>>, %arg6: memref<1x256xf32, #tpu.memory_space<vmem>>, %arg7: memref<1x1xf32, #tpu.memory_space<smem>>, %arg8: memref<1x1x256xf32, #tpu.memory_space<vmem>>) attributes {dimension_semantics = [#tpu.dimension_semantics<parallel>], iteration_bounds = array<i64: 1>, scalar_prefetch = 0 : i64, scratch_operands = 0 : i64, tpu.core_type = #tpu.core_type<tc>, window_params = [{transform_indices = @transform_0, window_bounds = array<i64: 256, 64>}, {pipeline_mode = #tpu.pipeline_mode<synchronous>, transform_indices = @transform_1, window_bounds = array<i64: 64, 256>}, {pipeline_mode = #tpu.pipeline_mode<synchronous>, transform_indices = @transform_2, window_bounds = array<i64: 1, 256>}, {pipeline_mode = #tpu.pipeline_mode<synchronous>, transform_indices = @transform_3, window_bounds = array<i64: 256, 256>}, {pipeline_mode = #tpu.pipeline_mode<synchronous>, transform_indices = @transform_4, window_bounds = array<i64: 1, 256>}, {pipeline_mode = #tpu.pipeline_mode<synchronous>, transform_indices = @transform_5, window_bounds = array<i64: 1, 256>}, {transform_indices = @transform_6, window_bounds = array<i64: 1, 1>}, {transform_indices = @transform_7, window_bounds = array<i64: 1, 1, 256>}]} {
    %c0 = arith.constant 0 : index
    %c0_0 = arith.constant 0 : index
    %0 = vector.load %arg1[%c0, %c0_0] : memref<256x64xbf16, #tpu.memory_space<vmem>>, vector<256x64xbf16>
    %c0_1 = arith.constant 0 : index
    %c0_2 = arith.constant 0 : index
    %1 = vector.load %arg2[%c0_1, %c0_2] : memref<64x256xbf16, #tpu.memory_space<vmem>>, vector<64x256xbf16>
    %cst = arith.constant dense<0.000000e+00> : vector<256x256xf32>
    %2 = tpu.matmul %0, %1, %cst {dimension_numbers = #tpu.dot_dimension_numbers<[1], [0], [0], [1], [0, 0, 1, 1], [], []>} : vector<256x64xbf16>, vector<64x256xbf16>, vector<256x256xf32> -> vector<256x256xf32>
    %c0_3 = arith.constant 0 : index
    %c0_4 = arith.constant 0 : index
    %3 = vector.load %arg3[%c0_3, %c0_4] : memref<1x256xf32, #tpu.memory_space<vmem>>, vector<1x256xf32>
    %4 = vector.broadcast %3 : vector<1x256xf32> to vector<256x256xf32>
    %5 = arith.addf %2, %4 : vector<256x256xf32>
    %cst_5 = arith.constant 0.000000e+00 : f32
    %6 = vector.broadcast %cst_5 : f32 to vector<256x256xf32>
    %7 = arith.maximumf %5, %6 : vector<256x256xf32>
    %8 = arith.truncf %7 : vector<256x256xf32> to vector<256x256xbf16>
    %c0_6 = arith.constant 0 : index
    %c0_7 = arith.constant 0 : index
    %9 = vector.load %arg4[%c0_6, %c0_7] : memref<256x256xbf16, #tpu.memory_space<vmem>>, vector<256x256xbf16>
    %cst_8 = arith.constant dense<0.000000e+00> : vector<256x256xf32>
    %10 = tpu.matmul %8, %9, %cst_8 {dimension_numbers = #tpu.dot_dimension_numbers<[1], [0], [0], [1], [0, 0, 1, 1], [], []>} : vector<256x256xbf16>, vector<256x256xbf16>, vector<256x256xf32> -> vector<256x256xf32>
    %c0_9 = arith.constant 0 : index
    %c0_10 = arith.constant 0 : index
    %11 = vector.load %arg5[%c0_9, %c0_10] : memref<1x256xf32, #tpu.memory_space<vmem>>, vector<1x256xf32>
    %12 = vector.broadcast %11 : vector<1x256xf32> to vector<256x256xf32>
    %13 = arith.addf %10, %12 : vector<256x256xf32>
    %cst_11 = arith.constant 0.000000e+00 : f32
    %14 = vector.broadcast %cst_11 : f32 to vector<256x256xf32>
    %15 = arith.maximumf %13, %14 : vector<256x256xf32>
    %c0_12 = arith.constant 0 : index
    %c0_13 = arith.constant 0 : index
    %16 = vector.load %arg6[%c0_12, %c0_13] : memref<1x256xf32, #tpu.memory_space<vmem>>, vector<1x256xf32>
    %17 = vector.broadcast %16 : vector<1x256xf32> to vector<256x256xf32>
    %18 = arith.mulf %15, %17 : vector<256x256xf32>
    %cst_14 = arith.constant dense<0.000000e+00> : vector<256xf32>
    %19 = vector.multi_reduction <add>, %18, %cst_14 [1] : vector<256x256xf32> to vector<256xf32>
    %20 = vector.shape_cast %19 : vector<256xf32> to vector<256x1xf32>
    %c0_15 = arith.constant 0 : index
    %c0_16 = arith.constant 0 : index
    %21 = memref.load %arg7[%c0_15, %c0_16] : memref<1x1xf32, #tpu.memory_space<smem>>
    %22 = vector.broadcast %21 : f32 to vector<256x1xf32>
    %23 = arith.addf %20, %22 : vector<256x1xf32>
    %24 = tpu.transpose %23, [1, 0] : vector<256x1xf32> -> vector<1x256xf32>
    %c0_17 = arith.constant 0 : index
    %c0_18 = arith.constant 0 : index
    %c0_19 = arith.constant 0 : index
    %25 = vector.load %arg8[%c0_17, %c0_18, %c0_19] : memref<1x1x256xf32, #tpu.memory_space<vmem>>, vector<1x1x256xf32>
    %26 = vector.shape_cast %25 : vector<1x1x256xf32> to vector<1x256xf32>
    %27 = vector.shape_cast %24 : vector<1x256xf32> to vector<1x1x256xf32>
    tpu.vector_store %arg8[%c0_17, %c0_18, %c0_19], %27 {strides = array<i32>} : memref<1x1x256xf32, #tpu.memory_space<vmem>>, vector<1x1x256xf32>,
    return
  }
  func.func @transform_0(%arg0: i32) -> (i32, i32) {
    %c0_i32 = arith.constant 0 : i32
    %c0_i32_0 = arith.constant 0 : i32
    return %arg0, %c0_i32 : i32, i32
  }
  func.func @transform_1(%arg0: i32) -> (i32, i32) {
    %c0_i32 = arith.constant 0 : i32
    %c0_i32_0 = arith.constant 0 : i32
    %c0_i32_1 = arith.constant 0 : i32
    return %c0_i32, %c0_i32_0 : i32, i32
  }
  func.func @transform_2(%arg0: i32) -> (i32, i32) {
    %c0_i32 = arith.constant 0 : i32
    %c0_i32_0 = arith.constant 0 : i32
    %c0_i32_1 = arith.constant 0 : i32
    return %c0_i32, %c0_i32_0 : i32, i32
  }
  func.func @transform_3(%arg0: i32) -> (i32, i32) {
    %c0_i32 = arith.constant 0 : i32
    %c0_i32_0 = arith.constant 0 : i32
    %c0_i32_1 = arith.constant 0 : i32
    return %c0_i32, %c0_i32_0 : i32, i32
  }
  func.func @transform_4(%arg0: i32) -> (i32, i32) {
    %c0_i32 = arith.constant 0 : i32
    %c0_i32_0 = arith.constant 0 : i32
    %c0_i32_1 = arith.constant 0 : i32
    return %c0_i32, %c0_i32_0 : i32, i32
  }
  func.func @transform_5(%arg0: i32) -> (i32, i32) {
    %c0_i32 = arith.constant 0 : i32
    %c0_i32_0 = arith.constant 0 : i32
    %c0_i32_1 = arith.constant 0 : i32
    return %c0_i32, %c0_i32_0 : i32, i32
  }
  func.func @transform_6(%arg0: i32) -> (i32, i32) {
    %c0_i32 = arith.constant 0 : i32
    %c0_i32_0 = arith.constant 0 : i32
    %c0_i32_1 = arith.constant 0 : i32
    return %c0_i32, %c0_i32_0 : i32, i32
  }
  func.func @transform_7(%arg0: i32) -> (i32, i32, i32) {
    %c0_i32 = arith.constant 0 : i32
    %c0_i32_0 = arith.constant 0 : i32
    %c0_i32_1 = arith.constant 0 : i32
    return %arg0, %c0_i32, %c0_i32_0 : i32, i32, i32
  }
}

</mosaic_0001>

<bundles_post_ra>
// kernel: sub.1
= control target key start
LH: loop header
LB: loop body
LE: loop exit
PB: predicated region body
PF: predicated region fallthrough
CT: control target
= control target key end

     0   :  { %s56_s0 = inlined_call_operand.vmem [shape: f32[1,256], index: 0, kind: input, shape index: {}]   ;;  %s57_s1 = inlined_call_operand.vmem [shape: f32[1,256], index: 1, kind: input, shape index: {}]   ;;  %s58_s2 = inlined_call_operand.vmem [shape: f32[1,256], index: 2, kind: output, shape index: {}]  }
   0x1   :  { %v3_v0 = vld [vmem:[%s56_s0] sm:$0x1]  ;;  %v20_v2 = vld [vmem:[%s56_s0 + $0x1] sm:$0x1] }
   0x2   :  { %v4_v1 = vld [vmem:[%s57_s1] sm:$0x1]  ;;  %v21_v4 = vld [vmem:[%s57_s1 + $0x1] sm:$0x1] }
   0x3   :  { %v7_v3 = vsub.f32 %v3_v0, %v4_v1  ;;  %v16_v5 = vsub.f32 %v20_v2, %v21_v4 }
   0x5   :  { %9 = vst [vmem:[%s58_s2] sm:$0x1] %v7_v3  ;;  %22 = vst [vmem:[%s58_s2 + $0x1] sm:$0x1] %v16_v5 }

// kernel: neuro_forward.1
= control target key start
LH: loop header
LB: loop body
LE: loop exit
PB: predicated region body
PF: predicated region fallthrough
CT: control target
= control target key end

     0   :  { %v1514_v2 = vmov 0   ;;  %vm201_vm0 = vcmask 523264   ;;  %s2036_s0 = inlined_call_operand.vmem [shape: bf16[256,64], index: 0, kind: input, shape index: {}]   ;;  %s2037_s1 = inlined_call_operand.vmem [shape: bf16[64,256], index: 1, kind: input, shape index: {}]   ;;  %s2038_s2 = inlined_call_operand.vmem [shape: f32[1,256], index: 2, kind: input, shape index: {}]   ;;  %s2039_s3 = inlined_call_operand.vmem [shape: bf16[256,256], index: 3, kind: input, shape index: {}]   ;;  %s2040_s4 = inlined_call_operand.vmem [shape: f32[1,256], index: 4, kind: input, shape index: {}]   ;;  %s2041_s5 = inlined_call_operand.vmem [shape: f32[1,256], index: 5, kind: input, shape index: {}]   ;;  %s2042_s6 = inlined_call_operand.<no memory space> [shape: f32[1,1], index: 6, kind: input, shape index: {}]   ;;  %s2043_s7 = inlined_call_operand.hbm [shape: f32[1,1,256], index: 7, kind: output, shape index: {}]  }
   0x1   :  { %v1414_v0 = vld [vmem:[%s2037_s1 + $0x4] ss:$8 sps:$4 sm:$0xff]   ;;  %v1416_v1 = vld [vmem:[%s2037_s1] ss:$8 sps:$4 sm:$0xff]   ;;  %282 = vmatprep.mubr.bf16.mxu0 %v1514_v2  ;;  %v1417_v3 = vld [vmem:[%s2037_s1 + $0x14] ss:$8 sps:$4 sm:$0xff]  }
   0x2   :  { %250 = vmatprep.subr.bf16.mxu0 %v1414_v0  ;;  %v1419_v4 = vld [vmem:[%s2037_s1 + $0x10] ss:$8 sps:$4 sm:$0xff]   ;;  %v1420_v5 = vld [vmem:[%s2037_s1 + $0x24] ss:$8 sps:$4 sm:$0xff]   ;;  %v1422_v6 = vld [vmem:[%s2037_s1 + $0x20] ss:$8 sps:$4 sm:$0xff]  }
   0x3   :  { %251 = vmatpush1.bf16.msra.mxu0 %v1416_v1  ;;  %v1423_v7 = vld [vmem:[%s2037_s1 + $0x34] ss:$8 sps:$4 sm:$0xff]   ;;  %v1425_v8 = vld [vmem:[%s2037_s1 + $0x30] ss:$8 sps:$4 sm:$0xff]   ;;  %v1426_v9 = vld [vmem:[%s2036_s0] sm:$0xff]  }
   0x4   :  { %252 = vmatprep.subr.bf16.mxu0 %v1417_v3  ;;  %v1427_v10 = vld [vmem:[%s2036_s0 + $0x8] sm:$0xff]   ;;  %v1447_v13 = vld [vmem:[%s2039_s3 + $0x14] ss:$8 sps:$4 sm:$0xff]   ;;  %v1445_v14 = vld [vmem:[%s2039_s3 + $0x10] ss:$8 sps:$4 sm:$0xff]  }
   0x5   :  { %v1442_v11 = vld [vmem:[%s2039_s3] ss:$8 sps:$4 sm:$0xff]   ;;  %v1444_v12 = vld [vmem:[%s2039_s3 + $0x4] ss:$8 sps:$4 sm:$0xff]   ;;  %v1428_v17 = vld [vmem:[%s2036_s0 + $0x10] sm:$0xff]  }
   0x6   :  { %1379 = vmatprep.subr.bf16.mxu1 %v1444_v12  ;;  %v1450_v15 = vld [vmem:[%s2039_s3 + $0x24] ss:$8 sps:$4 sm:$0xff]   ;;  %v1448_v16 = vld [vmem:[%s2039_s3 + $0x20] ss:$8 sps:$4 sm:$0xff]   ;;  %v1453_v18 = vld [vmem:[%s2039_s3 + $0x34] ss:$8 sps:$4 sm:$0xff]  }
   0x7   :  { %253 = vmatpush1.bf16.msra.mxu0 %v1419_v4  ;;  %1395 = vmatpush1.bf16.msra.mxu1 %v1442_v11  ;;  %v1451_v19 = vld [vmem:[%s2039_s3 + $0x30] ss:$8 sps:$4 sm:$0xff]   ;;  %v1456_v20 = vld [vmem:[%s2039_s3 + $0x44] ss:$8 sps:$4 sm:$0xff]   ;;  %v1454_v21 = vld [vmem:[%s2039_s3 + $0x40] ss:$8 sps:$4 sm:$0xff]  }
   0x8   :  { %254 = vmatprep.subr.bf16.mxu0 %v1420_v5  ;;  %1380 = vmatprep.subr.bf16.mxu1 %v1447_v13  ;;  %v1429_v22 = vld [vmem:[%s2036_s0 + $0x18] sm:$0xff]  }
   0x9   :  { %v1459_v23 = vld [vmem:[%s2039_s3 + $0x54] ss:$8 sps:$4 sm:$0xff]   ;;  %v1457_v24 = vld [vmem:[%s2039_s3 + $0x50] ss:$8 sps:$4 sm:$0xff]  }
   0xb   :  { %255 = vmatpush1.bf16.msra.mxu0 %v1422_v6  ;;  %1396 = vmatpush1.bf16.msra.mxu1 %v1445_v14 }
   0xc   :  { %256 = vmatprep.subr.bf16.mxu0 %v1423_v7  ;;  %1381 = vmatprep.subr.bf16.mxu1 %v1450_v15 }
   0xf   :  { %257 = vmatpush1.bf16.msra.mxu0 %v1425_v8  ;;  %1397 = vmatpush1.bf16.msra.mxu1 %v1448_v16 }
  0x10   :  { %743 = vmatprep.subr.bf16.mxu0 %v1444_v12  ;;  %1382 = vmatprep.subr.bf16.mxu1 %v1453_v18 }
  0x12   :  { %1331 = vmatmul.mubr.msk.bf16.vlgmr.msra.gmra.mrb[0].mxu0 %vm201_vm0, %v1426_v9 }
  0x13   :  { %292 = vmatprep.mubr.bf16.mxu0 %v1514_v2  ;;  %744 = vmatpush1.bf16.msra.mxu0 %v1442_v11 }
  0x14   :  { %745 = vmatprep.subr.bf16.mxu0 %v1447_v13  ;;  %1398 = vmatpush1.bf16.msra.mxu1 %v1451_v19 }
  0x15   :  { %1383 = vmatprep.subr.bf16.mxu1 %v1456_v20 }
  0x17   :  { %746 = vmatpush1.bf16.msra.mxu0 %v1445_v14 }
  0x18   :  { %747 = vmatprep.subr.bf16.mxu0 %v1450_v15  ;;  %1399 = vmatpush1.bf16.msra.mxu1 %v1454_v21 }
  0x1a   :  { %1332 = vmatmul.mubr.msk.bf16.gmra.mrb[4].mxu0 %vm201_vm0, %v1427_v10 }
  0x1b   :  { %302 = vmatprep.mubr.bf16.mxu0 %v1514_v2  ;;  %748 = vmatpush1.bf16.msra.mxu0 %v1448_v16 }
  0x1c   :  { %749 = vmatprep.subr.bf16.mxu0 %v1453_v18 }
  0x1f   :  { %750 = vmatpush1.bf16.msra.mxu0 %v1451_v19 }
  0x20   :  { %751 = vmatprep.subr.bf16.mxu0 %v1456_v20 }
  0x22   :  { %1333 = vmatmul.mubr.msk.bf16.gmra.mrb[8].mxu0 %vm201_vm0, %v1428_v17 }
  0x23   :  { %312 = vmatprep.mubr.bf16.mxu0 %v1514_v2  ;;  %752 = vmatpush1.bf16.msra.mxu0 %v1454_v21 }
  0x24   :  { %13 = vsyncpa [#allocation4], 0  ;;  %753 = vmatprep.subr.bf16.mxu0 %v1459_v23  ;;  %v1462_v25 = vld [vmem:[%s2039_s3 + $0x64] ss:$8 sps:$4 sm:$0xff]   ;;  %1384 = vmatprep.subr.bf16.mxu1 %v1459_v23  ;;  %v1460_v26 = vld [vmem:[%s2039_s3 + $0x60] ss:$8 sps:$4 sm:$0xff]   ;;  %v71_v57 = vlaneseq }
  0x25   :  { %1400 = vmatpush1.bf16.msra.mxu1 %v1457_v24  ;;  %v1430_v27 = vld [vmem:[%s2036_s0 + $0x20] sm:$0xff]   ;;  %v1465_v28 = vld [vmem:[%s2039_s3 + $0x74] ss:$8 sps:$4 sm:$0xff]   ;;  %v1463_v29 = vld [vmem:[%s2039_s3 + $0x70] ss:$8 sps:$4 sm:$0xff]  }
  0x26   :  { %1385 = vmatprep.subr.bf16.mxu1 %v1462_v25  ;;  %v1468_v30 = vld [vmem:[%s2039_s3 + $0x84] ss:$8 sps:$4 sm:$0xff]   ;;  %v1466_v31 = vld [vmem:[%s2039_s3 + $0x80] ss:$8 sps:$4 sm:$0xff]   ;;  %v1471_v33 = vld [vmem:[%s2039_s3 + $0x94] ss:$8 sps:$4 sm:$0xff]  }
  0x27   :  { %754 = vmatpush1.bf16.msra.mxu0 %v1457_v24  ;;  %v1431_v32 = vld [vmem:[%s2036_s0 + $0x28] sm:$0xff]   ;;  %v1469_v34 = vld [vmem:[%s2039_s3 + $0x90] ss:$8 sps:$4 sm:$0xff]   ;;  %v1477_v38 = vld [vmem:[%s2039_s3 + $0xb4] ss:$8 sps:$4 sm:$0xff]   ;;  %v1758_v58 = vshrl.u32 %v71_v57, 7 }
  0x28   :  { %755 = vmatprep.subr.bf16.mxu0 %v1462_v25  ;;  %v1474_v35 = vld [vmem:[%s2039_s3 + $0xa4] ss:$8 sps:$4 sm:$0xff]   ;;  %v1472_v36 = vld [vmem:[%s2039_s3 + $0xa0] ss:$8 sps:$4 sm:$0xff]   ;;  %v1432_v37 = vld [vmem:[%s2036_s0 + $0x30] sm:$0xff]   ;;  %vm1290_vm1 = vcmp.lt.s32.totalorder %v71_v57, 256 }
  0x29   :  { %1401 = vmatpush1.bf16.msra.mxu1 %v1460_v26  ;;  %v1475_v39 = vld [vmem:[%s2039_s3 + $0xb0] ss:$8 sps:$4 sm:$0xff]   ;;  %v1480_v40 = vld [vmem:[%s2039_s3 + $0xc4] ss:$8 sps:$4 sm:$0xff]   ;;  %v1478_v41 = vld [vmem:[%s2039_s3 + $0xc0] ss:$8 sps:$4 sm:$0xff]  }
  0x2a   :  { %1334 = vmatmul.mubr.msk.bf16.gmra.mrb[12].mxu0 %vm201_vm0, %v1429_v22  ;;  %1386 = vmatprep.subr.bf16.mxu1 %v1465_v28  ;;  %v1433_v42 = vld [vmem:[%s2036_s0 + $0x38] sm:$0xff]   ;;  %v1434_v45 = vld [vmem:[%s2036_s0 + $0x40] sm:$0xff]   ;;  %v1435_v46 = vld [vmem:[%s2036_s0 + $0x48] sm:$0xff]   ;;  %v1761_v59 = vsub.s32 0, %v1758_v58  ;;  %v1767_v61 = vsub.s32 1, %v1758_v58 }
  0x2b   :  { %322 = vmatprep.mubr.bf16.mxu0 %v1514_v2  ;;  %756 = vmatpush1.bf16.msra.mxu0 %v1460_v26  ;;  %v1483_v43 = vld [vmem:[%s2039_s3 + $0xd4] ss:$8 sps:$4 sm:$0xff]   ;;  %v1481_v44 = vld [vmem:[%s2039_s3 + $0xd0] ss:$8 sps:$4 sm:$0xff]   ;;  %v1486_v49 = vld [vmem:[%s2039_s3 + $0xe4] ss:$8 sps:$4 sm:$0xff]  }
  0x2c   :  { %757 = vmatprep.subr.bf16.mxu0 %v1465_v28  ;;  %v1436_v47 = vld [vmem:[%s2036_s0 + $0x50] sm:$0xff]   ;;  %v1437_v48 = vld [vmem:[%s2036_s0 + $0x58] sm:$0xff]   ;;  %v1484_v50 = vld [vmem:[%s2039_s3 + $0xe0] ss:$8 sps:$4 sm:$0xff]  }
  0x2d   :  { %1402 = vmatpush1.bf16.msra.mxu1 %v1463_v29  ;;  %v1489_v51 = vld [vmem:[%s2039_s3 + $0xf4] ss:$8 sps:$4 sm:$0xff]   ;;  %v1487_v52 = vld [vmem:[%s2039_s3 + $0xf0] ss:$8 sps:$4 sm:$0xff]   ;;  %v1438_v53 = vld [vmem:[%s2036_s0 + $0x60] sm:$0xff]  }
  0x2e   :  { %1387 = vmatprep.subr.bf16.mxu1 %v1468_v30  ;;  %v1439_v54 = vld [vmem:[%s2036_s0 + $0x68] sm:$0xff]   ;;  %v1440_v55 = vld [vmem:[%s2036_s0 + $0x70] sm:$0xff]   ;;  %v1441_v56 = vld [vmem:[%s2036_s0 + $0x78] sm:$0xff]  }
  0x2f   :  { %758 = vmatpush1.bf16.msra.mxu0 %v1463_v29  ;;  %v69_v60 = vld [vmem:[%s2038_s2] sm:$0x3] }
  0x30   :  { %759 = vmatprep.subr.bf16.mxu0 %v1468_v30  ;;  %v1770_v62 = vrot.slane %v69_v60, %v1761_v59  ;;  %v1773_v63 = vrot.slane %v69_v60, %v1767_v61 }
  0x31   :  { %1403 = vmatpush1.bf16.msra.mxu1 %v1466_v31 }
  0x32   :  { %1335 = vmatmul.mubr.msk.bf16.gmra.mrb[16].mxu0 %vm201_vm0, %v1430_v27  ;;  %1388 = vmatprep.subr.bf16.mxu1 %v1471_v33 }
  0x33   :  { %332 = vmatprep.mubr.bf16.mxu0 %v1514_v2  ;;  %760 = vmatpush1.bf16.msra.mxu0 %v1466_v31 }
  0x34   :  { %761 = vmatprep.subr.bf16.mxu0 %v1471_v33 }
  0x35   :  { %1404 = vmatpush1.bf16.msra.mxu1 %v1469_v34 }
  0x36   :  { %1389 = vmatprep.subr.bf16.mxu1 %v1474_v35 }
  0x37   :  { %762 = vmatpush1.bf16.msra.mxu0 %v1469_v34 }
  0x38   :  { %763 = vmatprep.subr.bf16.mxu0 %v1474_v35 }
  0x39   :  { %1405 = vmatpush1.bf16.msra.mxu1 %v1472_v36 }
  0x3a   :  { %1336 = vmatmul.mubr.msk.bf16.gmra.mrb[20].mxu0 %vm201_vm0, %v1431_v32  ;;  %1390 = vmatprep.subr.bf16.mxu1 %v1477_v38 }
  0x3b   :  { %342 = vmatprep.mubr.bf16.mxu0 %v1514_v2  ;;  %764 = vmatpush1.bf16.msra.mxu0 %v1472_v36 }
  0x3c   :  { %765 = vmatprep.subr.bf16.mxu0 %v1477_v38 }
  0x3d   :  { %1406 = vmatpush1.bf16.msra.mxu1 %v1475_v39 }
  0x3e   :  { %1391 = vmatprep.subr.bf16.mxu1 %v1480_v40 }
  0x3f   :  { %766 = vmatpush1.bf16.msra.mxu0 %v1475_v39 }
  0x40   :  { %767 = vmatprep.subr.bf16.mxu0 %v1480_v40 }
  0x41   :  { %1407 = vmatpush1.bf16.msra.mxu1 %v1478_v41 }
  0x42   :  { %1337 = vmatmul.mubr.msk.bf16.gmra.mrb[24].mxu0 %vm201_vm0, %v1432_v37  ;;  %1392 = vmatprep.subr.bf16.mxu1 %v1483_v43 }
  0x43   :  { %352 = vmatprep.mubr.bf16.mxu0 %v1514_v2  ;;  %768 = vmatpush1.bf16.msra.mxu0 %v1478_v41 }
  0x44   :  { %769 = vmatprep.subr.bf16.mxu0 %v1483_v43 }
  0x45   :  { %1408 = vmatpush1.bf16.msra.mxu1 %v1481_v44 }
  0x46   :  { %1393 = vmatprep.subr.bf16.mxu1 %v1486_v49 }
  0x47   :  { %770 = vmatpush1.bf16.msra.mxu0 %v1481_v44 }
  0x48   :  { %771 = vmatprep.subr.bf16.mxu0 %v1486_v49 }
  0x49   :  { %1409 = vmatpush1.bf16.msra.mxu1 %v1484_v50 }
  0x4a   :  { %1338 = vmatmul.mubr.msk.bf16.gmra.mrb[28].mxu0 %vm201_vm0, %v1433_v42  ;;  %1394 = vmatprep.subr.bf16.mxu1 %v1489_v51 }
  0x4b   :  { %362 = vmatprep.mubr.bf16.mxu0 %v1514_v2  ;;  %772 = vmatpush1.bf16.msra.mxu0 %v1484_v50 }
  0x4c   :  { %773 = vmatprep.subr.bf16.mxu0 %v1489_v51 }
  0x4d   :  { %1410 = vmatpush1.bf16.msra.mxu1 %v1487_v52 }
  0x4f   :  { %774 = vmatpush1.bf16.msra.mxu0 %v1487_v52 }
  0x52   :  { %1339 = vmatmul.mubr.msk.bf16.gmra.mrb[32].mxu0 %vm201_vm0, %v1434_v45 }
  0x53   :  { %372 = vmatprep.mubr.bf16.mxu0 %v1514_v2 }
  0x5a   :  { %1340 = vmatmul.mubr.msk.bf16.gmra.mrb[36].mxu0 %vm201_vm0, %v1435_v46 }
  0x5b   :  { %382 = vmatprep.mubr.bf16.mxu0 %v1514_v2 }
  0x62   :  { %1341 = vmatmul.mubr.msk.bf16.gmra.mrb[40].mxu0 %vm201_vm0, %v1436_v47 }
  0x63   :  { %392 = vmatprep.mubr.bf16.mxu0 %v1514_v2 }
  0x6a   :  { %1342 = vmatmul.mubr.msk.bf16.gmra.mrb[44].mxu0 %vm201_vm0, %v1437_v48 }
  0x6b   :  { %402 = vmatprep.mubr.bf16.mxu0 %v1514_v2 }
  0x72   :  { %1343 = vmatmul.mubr.msk.bf16.gmra.mrb[48].mxu0 %vm201_vm0, %v1438_v53 }
  0x73   :  { %412 = vmatprep.mubr.bf16.mxu0 %v1514_v2 }
  0x7a   :  { %1344 = vmatmul.mubr.msk.bf16.gmra.mrb[52].mxu0 %vm201_vm0, %v1439_v54 }
  0x7b   :  { %422 = vmatprep.mubr.bf16.mxu0 %v1514_v2 }
  0x82   :  { %1345 = vmatmul.mubr.msk.bf16.gmra.mrb[56].mxu0 %vm201_vm0, %v1440_v55 }
  0x83   :  { %432 = vmatprep.mubr.bf16.mxu0 %v1514_v2 }
  0x8a   :  { %1346 = vmatmul.mubr.msk.bf16.gmra.mrb[60].mxu0 %vm201_vm0, %v1441_v56 }
  0xe5   :  { %v284_v0 = vpop.f32.mrb[0].mxu0 }
  0xe6   :  { %v285_v1 = vadd.f32 %v284_v0, %v1770_v62  ;;  %v286_v2 = vpop.f32.mrb[1].mxu0 }
  0xe7   :  { %v287_v3 = vadd.f32 %v286_v2, %v1773_v63  ;;  %v288_v4 = vpop.f32.mrb[2].mxu0 }
  0xe8   :  { %v289_v5 = vadd.f32 %v288_v4, %v1770_v62  ;;  %v290_v6 = vpop.f32.mrb[3].mxu0  ;;  %v443_v8 = vmax.f32 %v285_v1, 0.0 }
  0xe9   :  { %v291_v7 = vadd.f32 %v290_v6, %v1773_v63  ;;  %v444_v10 = vmax.f32 %v287_v3, 0.0 }
  0xea   :  { %v445_v9 = vmax.f32 %v289_v5, 0.0 }
  0xeb   :  { %v446_v11 = vmax.f32 %v291_v7, 0.0 }
  0xec   :  { %v507_v12 = vpack.c.bf16 %v445_v9, %v443_v8 }
  0xed   :  { %v508_v13 = vpack.c.bf16 %v446_v11, %v444_v10  ;;  %v294_v14 = vpop.f32.mrb[4].mxu0 }
  0xee   :  { %v295_v15 = vadd.f32 %v294_v14, %v1770_v62  ;;  %v296_v16 = vpop.f32.mrb[5].mxu0 }
  0xef   :  { %v297_v17 = vadd.f32 %v296_v16, %v1773_v63  ;;  %v298_v18 = vpop.f32.mrb[6].mxu0  ;;  %775 = vmatprep.mubr.bf16.mxu0 %v508_v13 }
  0xf0   :  { %v299_v19 = vadd.f32 %v298_v18, %v1770_v62  ;;  %v300_v20 = vpop.f32.mrb[7].mxu0  ;;  %776 = vmatmul.mubr.bf16.vlgmr.msra.gmra.mrb[64].mxu0 %v507_v12  ;;  %v447_v22 = vmax.f32 %v295_v15, 0.0 }
  0xf1   :  { %v301_v21 = vadd.f32 %v300_v20, %v1773_v63  ;;  %v448_v24 = vmax.f32 %v297_v17, 0.0 }
  0xf2   :  { %v449_v23 = vmax.f32 %v299_v19, 0.0 }
  0xf3   :  { %v450_v25 = vmax.f32 %v301_v21, 0.0 }
  0xf4   :  { %v509_v26 = vpack.c.bf16 %v449_v23, %v447_v22 }
  0xf5   :  { %v510_v27 = vpack.c.bf16 %v450_v25, %v448_v24  ;;  %v304_v28 = vpop.f32.mrb[8].mxu0 }
  0xf6   :  { %v305_v29 = vadd.f32 %v304_v28, %v1770_v62  ;;  %v306_v30 = vpop.f32.mrb[9].mxu0 }
  0xf7   :  { %v307_v31 = vadd.f32 %v306_v30, %v1773_v63  ;;  %v308_v32 = vpop.f32.mrb[10].mxu0  ;;  %785 = vmatprep.mubr.bf16.mxu0 %v510_v27 }
  0xf8   :  { %v309_v33 = vadd.f32 %v308_v32, %v1770_v62  ;;  %v310_v34 = vpop.f32.mrb[11].mxu0  ;;  %786 = vmatmul.mubr.bf16.gmra.mrb[68].mxu0 %v509_v26  ;;  %v451_v36 = vmax.f32 %v305_v29, 0.0 }
  0xf9   :  { %v311_v35 = vadd.f32 %v310_v34, %v1773_v63  ;;  %v452_v38 = vmax.f32 %v307_v31, 0.0 }
  0xfa   :  { %v453_v37 = vmax.f32 %v309_v33, 0.0 }
  0xfb   :  { %v454_v39 = vmax.f32 %v311_v35, 0.0 }
  0xfc   :  { %v511_v40 = vpack.c.bf16 %v453_v37, %v451_v36 }
  0xfd   :  { %v512_v41 = vpack.c.bf16 %v454_v39, %v452_v38  ;;  %v314_v42 = vpop.f32.mrb[12].mxu0 }
  0xfe   :  { %v315_v43 = vadd.f32 %v314_v42, %v1770_v62  ;;  %v316_v44 = vpop.f32.mrb[13].mxu0 }
  0xff   :  { %v317_v45 = vadd.f32 %v316_v44, %v1773_v63  ;;  %v318_v46 = vpop.f32.mrb[14].mxu0  ;;  %795 = vmatprep.mubr.bf16.mxu0 %v512_v41 }
 0x100   :  { %v319_v47 = vadd.f32 %v318_v46, %v1770_v62  ;;  %v320_v48 = vpop.f32.mrb[15].mxu0  ;;  %796 = vmatmul.mubr.bf16.gmra.mrb[72].mxu0 %v511_v40  ;;  %v455_v50 = vmax.f32 %v315_v43, 0.0 }
 0x101   :  { %v321_v49 = vadd.f32 %v320_v48, %v1773_v63  ;;  %v456_v52 = vmax.f32 %v317_v45, 0.0 }
 0x102   :  { %v457_v51 = vmax.f32 %v319_v47, 0.0 }
 0x103   :  { %v458_v53 = vmax.f32 %v321_v49, 0.0 }
 0x104   :  { %v513_v54 = vpack.c.bf16 %v457_v51, %v455_v50 }
 0x105   :  { %v324_v55 = vpop.f32.mrb[16].mxu0  ;;  %v514_v56 = vpack.c.bf16 %v458_v53, %v456_v52 }
 0x106   :  { %v325_v60 = vadd.f32 %v324_v55, %v1770_v62  ;;  %v326_v0 = vpop.f32.mrb[17].mxu0 }
 0x107   :  { %v327_v1 = vadd.f32 %v326_v0, %v1773_v63  ;;  %v328_v2 = vpop.f32.mrb[18].mxu0  ;;  %805 = vmatprep.mubr.bf16.mxu1 %v514_v56 }
 0x108   :  { %v329_v3 = vadd.f32 %v328_v2, %v1770_v62  ;;  %v330_v4 = vpop.f32.mrb[19].mxu0  ;;  %806 = vmatmul.mubr.bf16.vlgmr.msra.gmra.mrb[0].mxu1 %v513_v54  ;;  %v459_v6 = vmax.f32 %v325_v60, 0.0 }
 0x109   :  { %v331_v5 = vadd.f32 %v330_v4, %v1773_v63  ;;  %v460_v8 = vmax.f32 %v327_v1, 0.0 }
 0x10a   :  { %v461_v7 = vmax.f32 %v329_v3, 0.0 }
 0x10b   :  { %v462_v9 = vmax.f32 %v331_v5, 0.0 }
 0x10c   :  { %v515_v10 = vpack.c.bf16 %v461_v7, %v459_v6 }
 0x10d   :  { %v516_v11 = vpack.c.bf16 %v462_v9, %v460_v8  ;;  %v334_v12 = vpop.f32.mrb[20].mxu0 }
 0x10e   :  { %v335_v13 = vadd.f32 %v334_v12, %v1770_v62  ;;  %v336_v14 = vpop.f32.mrb[21].mxu0 }
 0x10f   :  { %v337_v15 = vadd.f32 %v336_v14, %v1773_v63  ;;  %v338_v16 = vpop.f32.mrb[22].mxu0  ;;  %815 = vmatprep.mubr.bf16.mxu1 %v516_v11 }
 0x110   :  { %v339_v17 = vadd.f32 %v338_v16, %v1770_v62  ;;  %v340_v18 = vpop.f32.mrb[23].mxu0  ;;  %816 = vmatmul.mubr.bf16.gmra.mrb[4].mxu1 %v515_v10  ;;  %v463_v20 = vmax.f32 %v335_v13, 0.0 }
 0x111   :  { %v341_v19 = vadd.f32 %v340_v18, %v1773_v63  ;;  %v464_v22 = vmax.f32 %v337_v15, 0.0 }
 0x112   :  { %v465_v21 = vmax.f32 %v339_v17, 0.0 }
 0x113   :  { %v466_v23 = vmax.f32 %v341_v19, 0.0 }
 0x114   :  { %v517_v24 = vpack.c.bf16 %v465_v21, %v463_v20 }
 0x115   :  { %v518_v25 = vpack.c.bf16 %v466_v23, %v464_v22  ;;  %v344_v26 = vpop.f32.mrb[24].mxu0 }
 0x116   :  { %v345_v27 = vadd.f32 %v344_v26, %v1770_v62  ;;  %v346_v28 = vpop.f32.mrb[25].mxu0 }
 0x117   :  { %v347_v29 = vadd.f32 %v346_v28, %v1773_v63  ;;  %v348_v30 = vpop.f32.mrb[26].mxu0  ;;  %825 = vmatprep.mubr.bf16.mxu1 %v518_v25 }
 0x118   :  { %v349_v31 = vadd.f32 %v348_v30, %v1770_v62  ;;  %v350_v32 = vpop.f32.mrb[27].mxu0  ;;  %826 = vmatmul.mubr.bf16.gmra.mrb[8].mxu1 %v517_v24  ;;  %v467_v34 = vmax.f32 %v345_v27, 0.0 }
 0x119   :  { %v351_v33 = vadd.f32 %v350_v32, %v1773_v63  ;;  %v468_v36 = vmax.f32 %v347_v29, 0.0 }
 0x11a   :  { %v469_v35 = vmax.f32 %v349_v31, 0.0 }
 0x11b   :  { %v470_v37 = vmax.f32 %v351_v33, 0.0 }
 0x11c   :  { %v519_v38 = vpack.c.bf16 %v469_v35, %v467_v34 }
 0x11d   :  { %v520_v39 = vpack.c.bf16 %v470_v37, %v468_v36  ;;  %v354_v40 = vpop.f32.mrb[28].mxu0 }
 0x11e   :  { %v355_v41 = vadd.f32 %v354_v40, %v1770_v62  ;;  %v356_v42 = vpop.f32.mrb[29].mxu0 }
 0x11f   :  { %v357_v43 = vadd.f32 %v356_v42, %v1773_v63  ;;  %v358_v44 = vpop.f32.mrb[30].mxu0  ;;  %835 = vmatprep.mubr.bf16.mxu1 %v520_v39 }
 0x120   :  { %v359_v45 = vadd.f32 %v358_v44, %v1770_v62  ;;  %v360_v46 = vpop.f32.mrb[31].mxu0  ;;  %836 = vmatmul.mubr.bf16.gmra.mrb[12].mxu1 %v519_v38  ;;  %v471_v48 = vmax.f32 %v355_v41, 0.0 }
 0x121   :  { %v361_v47 = vadd.f32 %v360_v46, %v1773_v63  ;;  %v472_v50 = vmax.f32 %v357_v43, 0.0 }
 0x122   :  { %v473_v49 = vmax.f32 %v359_v45, 0.0 }
 0x123   :  { %v474_v51 = vmax.f32 %v361_v47, 0.0 }
 0x124   :  { %v521_v52 = vpack.c.bf16 %v473_v49, %v471_v48 }
 0x125   :  { %v522_v53 = vpack.c.bf16 %v474_v51, %v472_v50  ;;  %v364_v54 = vpop.f32.mrb[32].mxu0 }
 0x126   :  { %v365_v55 = vadd.f32 %v364_v54, %v1770_v62  ;;  %v366_v56 = vpop.f32.mrb[33].mxu0 }
 0x127   :  { %v367_v60 = vadd.f32 %v366_v56, %v1773_v63  ;;  %v368_v0 = vpop.f32.mrb[34].mxu0  ;;  %845 = vmatprep.mubr.bf16.mxu1 %v522_v53 }
 0x128   :  { %v369_v1 = vadd.f32 %v368_v0, %v1770_v62  ;;  %v370_v2 = vpop.f32.mrb[35].mxu0  ;;  %846 = vmatmul.mubr.bf16.gmra.mrb[16].mxu1 %v521_v52  ;;  %v475_v4 = vmax.f32 %v365_v55, 0.0 }
 0x129   :  { %v371_v3 = vadd.f32 %v370_v2, %v1773_v63  ;;  %v476_v6 = vmax.f32 %v367_v60, 0.0 }
 0x12a   :  { %v477_v5 = vmax.f32 %v369_v1, 0.0 }
 0x12b   :  { %v478_v7 = vmax.f32 %v371_v3, 0.0 }
 0x12c   :  { %v523_v8 = vpack.c.bf16 %v477_v5, %v475_v4 }
 0x12d   :  { %v524_v9 = vpack.c.bf16 %v478_v7, %v476_v6  ;;  %v374_v10 = vpop.f32.mrb[36].mxu0 }
 0x12e   :  { %v375_v11 = vadd.f32 %v374_v10, %v1770_v62  ;;  %v376_v12 = vpop.f32.mrb[37].mxu0 }
 0x12f   :  { %v377_v13 = vadd.f32 %v376_v12, %v1773_v63  ;;  %v378_v14 = vpop.f32.mrb[38].mxu0  ;;  %855 = vmatprep.mubr.bf16.mxu1 %v524_v9 }
 0x130   :  { %v379_v15 = vadd.f32 %v378_v14, %v1770_v62  ;;  %v380_v16 = vpop.f32.mrb[39].mxu0  ;;  %856 = vmatmul.mubr.bf16.gmra.mrb[20].mxu1 %v523_v8  ;;  %v479_v18 = vmax.f32 %v375_v11, 0.0 }
 0x131   :  { %v381_v17 = vadd.f32 %v380_v16, %v1773_v63  ;;  %v480_v20 = vmax.f32 %v377_v13, 0.0 }
 0x132   :  { %v481_v19 = vmax.f32 %v379_v15, 0.0 }
 0x133   :  { %v482_v21 = vmax.f32 %v381_v17, 0.0 }
 0x134   :  { %v525_v22 = vpack.c.bf16 %v481_v19, %v479_v18 }
 0x135   :  { %v526_v23 = vpack.c.bf16 %v482_v21, %v480_v20  ;;  %v384_v24 = vpop.f32.mrb[40].mxu0 }
 0x136   :  { %v385_v25 = vadd.f32 %v384_v24, %v1770_v62  ;;  %v386_v26 = vpop.f32.mrb[41].mxu0 }
 0x137   :  { %v387_v27 = vadd.f32 %v386_v26, %v1773_v63  ;;  %v388_v28 = vpop.f32.mrb[42].mxu0  ;;  %865 = vmatprep.mubr.bf16.mxu1 %v526_v23 }
 0x138   :  { %v389_v29 = vadd.f32 %v388_v28, %v1770_v62  ;;  %v390_v30 = vpop.f32.mrb[43].mxu0  ;;  %866 = vmatmul.mubr.bf16.gmra.mrb[24].mxu1 %v525_v22  ;;  %v483_v32 = vmax.f32 %v385_v25, 0.0 }
 0x139   :  { %v391_v31 = vadd.f32 %v390_v30, %v1773_v63  ;;  %v484_v34 = vmax.f32 %v387_v27, 0.0 }
 0x13a   :  { %v485_v33 = vmax.f32 %v389_v29, 0.0 }
 0x13b   :  { %v486_v35 = vmax.f32 %v391_v31, 0.0 }
 0x13c   :  { %v527_v36 = vpack.c.bf16 %v485_v33, %v483_v32 }
 0x13d   :  { %v528_v37 = vpack.c.bf16 %v486_v35, %v484_v34  ;;  %v394_v38 = vpop.f32.mrb[44].mxu0 }
 0x13e   :  { %v395_v39 = vadd.f32 %v394_v38, %v1770_v62  ;;  %v396_v40 = vpop.f32.mrb[45].mxu0 }
 0x13f   :  { %v397_v41 = vadd.f32 %v396_v40, %v1773_v63  ;;  %v398_v42 = vpop.f32.mrb[46].mxu0  ;;  %875 = vmatprep.mubr.bf16.mxu1 %v528_v37 }
 0x140   :  { %v399_v43 = vadd.f32 %v398_v42, %v1770_v62  ;;  %v400_v44 = vpop.f32.mrb[47].mxu0  ;;  %876 = vmatmul.mubr.bf16.gmra.mrb[28].mxu1 %v527_v36  ;;  %v487_v46 = vmax.f32 %v395_v39, 0.0 }
 0x141   :  { %v401_v45 = vadd.f32 %v400_v44, %v1773_v63  ;;  %v488_v48 = vmax.f32 %v397_v41, 0.0 }
 0x142   :  { %v489_v47 = vmax.f32 %v399_v43, 0.0 }
 0x143   :  { %v490_v49 = vmax.f32 %v401_v45, 0.0 }
 0x144   :  { %v529_v50 = vpack.c.bf16 %v489_v47, %v487_v46 }
 0x145   :  { %v530_v51 = vpack.c.bf16 %v490_v49, %v488_v48  ;;  %v404_v52 = vpop.f32.mrb[48].mxu0 }
 0x146   :  { %v405_v53 = vadd.f32 %v404_v52, %v1770_v62  ;;  %v406_v54 = vpop.f32.mrb[49].mxu0 }
 0x147   :  { %v407_v55 = vadd.f32 %v406_v54, %v1773_v63  ;;  %v408_v56 = vpop.f32.mrb[50].mxu0  ;;  %885 = vmatprep.mubr.bf16.mxu1 %v530_v51 }
 0x148   :  { %v409_v60 = vadd.f32 %v408_v56, %v1770_v62  ;;  %v410_v0 = vpop.f32.mrb[51].mxu0  ;;  %886 = vmatmul.mubr.bf16.gmra.mrb[32].mxu1 %v529_v50  ;;  %v491_v2 = vmax.f32 %v405_v53, 0.0  ;;  %v571_v50 = vld [vmem:[%s2040_s4] sm:$0x3] }
 0x149   :  { %v411_v1 = vadd.f32 %v410_v0, %v1773_v63  ;;  %v492_v4 = vmax.f32 %v407_v55, 0.0  ;;  %v1843_v51 = vrot.slane %v571_v50, %v1761_v59 }
 0x14a   :  { %v493_v3 = vmax.f32 %v409_v60, 0.0 }
 0x14b   :  { %v494_v5 = vmax.f32 %v411_v1, 0.0 }
 0x14c   :  { %v531_v6 = vpack.c.bf16 %v493_v3, %v491_v2 }
 0x14d   :  { %v532_v7 = vpack.c.bf16 %v494_v5, %v492_v4  ;;  %v414_v8 = vpop.f32.mrb[52].mxu0 }
 0x14e   :  { %v415_v9 = vadd.f32 %v414_v8, %v1770_v62  ;;  %v416_v10 = vpop.f32.mrb[53].mxu0 }
 0x14f   :  { %v417_v11 = vadd.f32 %v416_v10, %v1773_v63  ;;  %v418_v12 = vpop.f32.mrb[54].mxu0  ;;  %895 = vmatprep.mubr.bf16.mxu1 %v532_v7 }
 0x150   :  { %v419_v13 = vadd.f32 %v418_v12, %v1770_v62  ;;  %v420_v14 = vpop.f32.mrb[55].mxu0  ;;  %896 = vmatmul.mubr.bf16.gmra.mrb[36].mxu1 %v531_v6  ;;  %v495_v16 = vmax.f32 %v415_v9, 0.0 }
 0x151   :  { %v421_v15 = vadd.f32 %v420_v14, %v1773_v63  ;;  %v496_v18 = vmax.f32 %v417_v11, 0.0 }
 0x152   :  { %v497_v17 = vmax.f32 %v419_v13, 0.0 }
 0x153   :  { %v498_v19 = vmax.f32 %v421_v15, 0.0 }
 0x154   :  { %v533_v20 = vpack.c.bf16 %v497_v17, %v495_v16 }
 0x155   :  { %v534_v21 = vpack.c.bf16 %v498_v19, %v496_v18  ;;  %v424_v22 = vpop.f32.mrb[56].mxu0 }
 0x156   :  { %v425_v23 = vadd.f32 %v424_v22, %v1770_v62  ;;  %v426_v24 = vpop.f32.mrb[57].mxu0 }
 0x157   :  { %v427_v25 = vadd.f32 %v426_v24, %v1773_v63  ;;  %v428_v26 = vpop.f32.mrb[58].mxu0  ;;  %905 = vmatprep.mubr.bf16.mxu1 %v534_v21 }
 0x158   :  { %v429_v27 = vadd.f32 %v428_v26, %v1770_v62  ;;  %v430_v28 = vpop.f32.mrb[59].mxu0  ;;  %906 = vmatmul.mubr.bf16.gmra.mrb[40].mxu1 %v533_v20  ;;  %v499_v30 = vmax.f32 %v425_v23, 0.0 }
 0x159   :  { %v431_v29 = vadd.f32 %v430_v28, %v1773_v63  ;;  %v500_v32 = vmax.f32 %v427_v25, 0.0 }
 0x15a   :  { %v501_v31 = vmax.f32 %v429_v27, 0.0 }
 0x15b   :  { %v502_v33 = vmax.f32 %v431_v29, 0.0 }
 0x15c   :  { %v535_v34 = vpack.c.bf16 %v501_v31, %v499_v30 }
 0x15d   :  { %v536_v35 = vpack.c.bf16 %v502_v33, %v500_v32  ;;  %v434_v36 = vpop.f32.mrb[60].mxu0 }
 0x15e   :  { %v435_v37 = vadd.f32 %v434_v36, %v1770_v62  ;;  %v436_v38 = vpop.f32.mrb[61].mxu0 }
 0x15f   :  { %v437_v39 = vadd.f32 %v436_v38, %v1773_v63  ;;  %v438_v40 = vpop.f32.mrb[62].mxu0  ;;  %915 = vmatprep.mubr.bf16.mxu1 %v536_v35 }
 0x160   :  { %v439_v41 = vadd.f32 %v438_v40, %v1770_v62  ;;  %v440_v42 = vpop.f32.mrb[63].mxu0  ;;  %916 = vmatmul.mubr.bf16.gmra.mrb[44].mxu1 %v535_v34  ;;  %v503_v44 = vmax.f32 %v435_v37, 0.0  ;;  %v1846_v62 = vrot.slane %v571_v50, %v1767_v61 }
 0x161   :  { %v441_v43 = vadd.f32 %v440_v42, %v1773_v63  ;;  %v504_v46 = vmax.f32 %v437_v39, 0.0  ;;  %v1000_v63 = vld [vmem:[%s2041_s5] sm:$0x3] }
 0x162   :  { %v505_v45 = vmax.f32 %v439_v41, 0.0  ;;  %v1853_v55 = vrot.slane %v1000_v63, %v1761_v59  ;;  %v1857_v0 = vrot.slane %v1000_v63, %v1767_v61 }
 0x163   :  { %v506_v47 = vmax.f32 %v441_v43, 0.0 }
 0x164   :  { %v537_v48 = vpack.c.bf16 %v505_v45, %v503_v44 }
 0x165   :  { %v538_v49 = vpack.c.bf16 %v506_v47, %v504_v46 }
 0x167   :  { %925 = vmatprep.mubr.bf16.mxu1 %v538_v49 }
 0x168   :  { %926 = vmatmul.mubr.bf16.gmra.mrb[48].mxu1 %v537_v48 }
 0x1c3   :  { %v777_v52 = vpop.f32.mrb[64].mxu0 }
 0x1c4   :  { %v778_v53 = vadd.f32 %v777_v52, %v1843_v51  ;;  %v779_v54 = vpop.f32.mrb[65].mxu0 }
 0x1c5   :  { %v780_v56 = vadd.f32 %v779_v54, %v1846_v62  ;;  %v781_v60 = vpop.f32.mrb[66].mxu0 }
 0x1c6   :  { %v936_v1 = vmax.f32 %v778_v53, 0.0  ;;  %v782_v2 = vadd.f32 %v781_v60, %v1843_v51  ;;  %v783_v3 = vpop.f32.mrb[67].mxu0 }
 0x1c7   :  { %v937_v4 = vmax.f32 %v780_v56, 0.0  ;;  %v784_v5 = vadd.f32 %v783_v3, %v1846_v62 }
 0x1c8   :  { %v938_v6 = vmax.f32 %v782_v2, 0.0  ;;  %v1012_v7 = vmul.f32 %v1853_v55, %v936_v1 }
 0x1c9   :  { %v939_v8 = vmax.f32 %v784_v5, 0.0  ;;  %v1013_v59 = vmul.f32 %v1857_v0, %v937_v4 }
 0x1ca   :  { %v1014_v9 = vmul.f32 %v1853_v55, %v938_v6 }
 0x1cb   :  { %v1015_v10 = vmul.f32 %v1857_v0, %v939_v8  ;;  %v787_v11 = vpop.f32.mrb[68].mxu0  ;;  %v1076_v61 = vadd.f32 %v1013_v59, %v1012_v7 }
 0x1cc   :  { %v788_v12 = vadd.f32 %v787_v11, %v1843_v51  ;;  %v789_v13 = vpop.f32.mrb[69].mxu0 }
 0x1cd   :  { %v790_v14 = vadd.f32 %v789_v13, %v1846_v62  ;;  %v791_v15 = vpop.f32.mrb[70].mxu0  ;;  %1077 = vadd.xlane.f32.xlu0 %v1076_v61  ;;  %v1079_v16 = vadd.f32 %v1015_v10, %v1014_v9 }
 0x1ce   :  { %v940_v17 = vmax.f32 %v788_v12, 0.0  ;;  %v792_v18 = vadd.f32 %v791_v15, %v1843_v51  ;;  %v793_v19 = vpop.f32.mrb[71].mxu0 }
 0x1cf   :  { %v941_v20 = vmax.f32 %v790_v14, 0.0  ;;  %v794_v21 = vadd.f32 %v793_v19, %v1846_v62 }
 0x1d0   :  { %v1016_v22 = vmul.f32 %v1853_v55, %v940_v17  ;;  %v942_v23 = vmax.f32 %v792_v18, 0.0 }
 0x1d1   :  { %v1017_v24 = vmul.f32 %v1857_v0, %v941_v20  ;;  %v943_v25 = vmax.f32 %v794_v21, 0.0  ;;  %1080 = vadd.xlane.f32.xlu0 %v1079_v16 }
 0x1d2   :  { %v1018_v26 = vmul.f32 %v1853_v55, %v942_v23 }
 0x1d3   :  { %v1019_v27 = vmul.f32 %v1857_v0, %v943_v25  ;;  %v797_v28 = vpop.f32.mrb[72].mxu0  ;;  %v1082_v29 = vadd.f32 %v1017_v24, %v1016_v22 }
 0x1d4   :  { %v798_v30 = vadd.f32 %v797_v28, %v1843_v51  ;;  %v799_v31 = vpop.f32.mrb[73].mxu0 }
 0x1d5   :  { %v800_v32 = vadd.f32 %v799_v31, %v1846_v62  ;;  %v801_v33 = vpop.f32.mrb[74].mxu0  ;;  %1083 = vadd.xlane.f32.xlu0 %v1082_v29  ;;  %v1085_v34 = vadd.f32 %v1019_v27, %v1018_v26 }
 0x1d6   :  { %v944_v35 = vmax.f32 %v798_v30, 0.0  ;;  %v802_v36 = vadd.f32 %v801_v33, %v1843_v51  ;;  %v803_v37 = vpop.f32.mrb[75].mxu0 }
 0x1d7   :  { %v945_v38 = vmax.f32 %v800_v32, 0.0  ;;  %v804_v39 = vadd.f32 %v803_v37, %v1846_v62 }
 0x1d8   :  { %v1020_v40 = vmul.f32 %v1853_v55, %v944_v35  ;;  %v946_v41 = vmax.f32 %v802_v36, 0.0 }
 0x1d9   :  { %v1021_v42 = vmul.f32 %v1857_v0, %v945_v38  ;;  %v947_v43 = vmax.f32 %v804_v39, 0.0  ;;  %1086 = vadd.xlane.f32.xlu0 %v1085_v34 }
 0x1da   :  { %v1022_v44 = vmul.f32 %v1853_v55, %v946_v41 }
 0x1db   :  { %v1023_v45 = vmul.f32 %v1857_v0, %v947_v43  ;;  %v807_v46 = vpop.f32.mrb[0].mxu1  ;;  %v1088_v47 = vadd.f32 %v1021_v42, %v1020_v40 }
 0x1dc   :  { %v808_v48 = vadd.f32 %v807_v46, %v1843_v51  ;;  %v809_v49 = vpop.f32.mrb[1].mxu1 }
 0x1dd   :  { %v810_v50 = vadd.f32 %v809_v49, %v1846_v62  ;;  %v811_v63 = vpop.f32.mrb[2].mxu1  ;;  %1089 = vadd.xlane.f32.xlu0 %v1088_v47  ;;  %v1091_v52 = vadd.f32 %v1023_v45, %v1022_v44 }
 0x1de   :  { %v948_v53 = vmax.f32 %v808_v48, 0.0  ;;  %v812_v54 = vadd.f32 %v811_v63, %v1843_v51  ;;  %v813_v56 = vpop.f32.mrb[3].mxu1 }
 0x1df   :  { %v949_v60 = vmax.f32 %v810_v50, 0.0  ;;  %v814_v1 = vadd.f32 %v813_v56, %v1846_v62 }
 0x1e0   :  { %v1024_v2 = vmul.f32 %v1853_v55, %v948_v53  ;;  %v950_v3 = vmax.f32 %v812_v54, 0.0 }
 0x1e1   :  { %v1025_v4 = vmul.f32 %v1857_v0, %v949_v60  ;;  %v951_v5 = vmax.f32 %v814_v1, 0.0  ;;  %1092 = vadd.xlane.f32.xlu0 %v1091_v52 }
 0x1e2   :  { %v1026_v6 = vmul.f32 %v1853_v55, %v950_v3 }
 0x1e3   :  { %v1027_v7 = vmul.f32 %v1857_v0, %v951_v5  ;;  %v817_v8 = vpop.f32.mrb[4].mxu1  ;;  %v1094_v59 = vadd.f32 %v1025_v4, %v1024_v2 }
 0x1e4   :  { %v818_v9 = vadd.f32 %v817_v8, %v1843_v51  ;;  %v819_v10 = vpop.f32.mrb[5].mxu1 }
 0x1e5   :  { %v820_v11 = vadd.f32 %v819_v10, %v1846_v62  ;;  %v821_v61 = vpop.f32.mrb[6].mxu1  ;;  %1095 = vadd.xlane.f32.xlu0 %v1094_v59  ;;  %v1097_v12 = vadd.f32 %v1027_v7, %v1026_v6 }
 0x1e6   :  { %v952_v13 = vmax.f32 %v818_v9, 0.0  ;;  %v822_v14 = vadd.f32 %v821_v61, %v1843_v51  ;;  %v823_v15 = vpop.f32.mrb[7].mxu1 }
 0x1e7   :  { %v953_v16 = vmax.f32 %v820_v11, 0.0  ;;  %v824_v17 = vadd.f32 %v823_v15, %v1846_v62 }
 0x1e8   :  { %v1028_v18 = vmul.f32 %v1853_v55, %v952_v13  ;;  %v954_v19 = vmax.f32 %v822_v14, 0.0 }
 0x1e9   :  { %v1029_v20 = vmul.f32 %v1857_v0, %v953_v16  ;;  %v955_v21 = vmax.f32 %v824_v17, 0.0  ;;  %1098 = vadd.xlane.f32.xlu0 %v1097_v12 }
 0x1ea   :  { %v1030_v22 = vmul.f32 %v1853_v55, %v954_v19 }
 0x1eb   :  { %v1031_v23 = vmul.f32 %v1857_v0, %v955_v21  ;;  %v827_v24 = vpop.f32.mrb[8].mxu1  ;;  %v1100_v25 = vadd.f32 %v1029_v20, %v1028_v18 }
 0x1ec   :  { %v828_v26 = vadd.f32 %v827_v24, %v1843_v51  ;;  %v829_v27 = vpop.f32.mrb[9].mxu1 }
 0x1ed   :  { %v830_v28 = vadd.f32 %v829_v27, %v1846_v62  ;;  %v831_v29 = vpop.f32.mrb[10].mxu1  ;;  %1101 = vadd.xlane.f32.xlu0 %v1100_v25  ;;  %v1103_v30 = vadd.f32 %v1031_v23, %v1030_v22 }
 0x1ee   :  { %v956_v31 = vmax.f32 %v828_v26, 0.0  ;;  %v832_v32 = vadd.f32 %v831_v29, %v1843_v51  ;;  %v833_v33 = vpop.f32.mrb[11].mxu1 }
 0x1ef   :  { %v957_v34 = vmax.f32 %v830_v28, 0.0  ;;  %v834_v35 = vadd.f32 %v833_v33, %v1846_v62 }
 0x1f0   :  { %v1032_v36 = vmul.f32 %v1853_v55, %v956_v31  ;;  %v958_v37 = vmax.f32 %v832_v32, 0.0 }
 0x1f1   :  { %v1033_v38 = vmul.f32 %v1857_v0, %v957_v34  ;;  %v959_v39 = vmax.f32 %v834_v35, 0.0  ;;  %1104 = vadd.xlane.f32.xlu0 %v1103_v30 }
 0x1f2   :  { %v1034_v40 = vmul.f32 %v1853_v55, %v958_v37 }
 0x1f3   :  { %v1035_v41 = vmul.f32 %v1857_v0, %v959_v39  ;;  %v837_v42 = vpop.f32.mrb[12].mxu1  ;;  %v1106_v43 = vadd.f32 %v1033_v38, %v1032_v36 }
 0x1f4   :  { %v838_v44 = vadd.f32 %v837_v42, %v1843_v51  ;;  %v839_v45 = vpop.f32.mrb[13].mxu1 }
 0x1f5   :  { %v840_v46 = vadd.f32 %v839_v45, %v1846_v62  ;;  %v841_v47 = vpop.f32.mrb[14].mxu1  ;;  %1107 = vadd.xlane.f32.xlu0 %v1106_v43  ;;  %v1109_v48 = vadd.f32 %v1035_v41, %v1034_v40 }
 0x1f6   :  { %v960_v49 = vmax.f32 %v838_v44, 0.0  ;;  %v842_v50 = vadd.f32 %v841_v47, %v1843_v51  ;;  %v843_v63 = vpop.f32.mrb[15].mxu1 }
 0x1f7   :  { %v961_v52 = vmax.f32 %v840_v46, 0.0  ;;  %v844_v53 = vadd.f32 %v843_v63, %v1846_v62 }
 0x1f8   :  { %v1036_v54 = vmul.f32 %v1853_v55, %v960_v49  ;;  %v962_v56 = vmax.f32 %v842_v50, 0.0 }
 0x1f9   :  { %v1037_v60 = vmul.f32 %v1857_v0, %v961_v52  ;;  %v963_v1 = vmax.f32 %v844_v53, 0.0  ;;  %1110 = vadd.xlane.f32.xlu0 %v1109_v48 }
 0x1fa   :  { %v1038_v2 = vmul.f32 %v1853_v55, %v962_v56 }
 0x1fb   :  { %v1039_v3 = vmul.f32 %v1857_v0, %v963_v1  ;;  %v847_v4 = vpop.f32.mrb[16].mxu1  ;;  %v1112_v5 = vadd.f32 %v1037_v60, %v1036_v54 }
 0x1fc   :  { %v848_v6 = vadd.f32 %v847_v4, %v1843_v51  ;;  %v849_v7 = vpop.f32.mrb[17].mxu1 }
 0x1fd   :  { %v850_v8 = vadd.f32 %v849_v7, %v1846_v62  ;;  %v851_v59 = vpop.f32.mrb[18].mxu1  ;;  %1113 = vadd.xlane.f32.xlu0 %v1112_v5  ;;  %v1115_v9 = vadd.f32 %v1039_v3, %v1038_v2 }
 0x1fe   :  { %v964_v10 = vmax.f32 %v848_v6, 0.0  ;;  %v852_v11 = vadd.f32 %v851_v59, %v1843_v51  ;;  %v853_v61 = vpop.f32.mrb[19].mxu1 }
 0x1ff   :  { %v965_v12 = vmax.f32 %v850_v8, 0.0  ;;  %v854_v13 = vadd.f32 %v853_v61, %v1846_v62 }
 0x200   :  { %v1040_v14 = vmul.f32 %v1853_v55, %v964_v10  ;;  %v966_v15 = vmax.f32 %v852_v11, 0.0 }
 0x201   :  { %v1041_v16 = vmul.f32 %v1857_v0, %v965_v12  ;;  %v967_v17 = vmax.f32 %v854_v13, 0.0  ;;  %1116 = vadd.xlane.f32.xlu0 %v1115_v9 }
 0x202   :  { %v1042_v18 = vmul.f32 %v1853_v55, %v966_v15 }
 0x203   :  { %v1043_v19 = vmul.f32 %v1857_v0, %v967_v17  ;;  %v857_v20 = vpop.f32.mrb[20].mxu1  ;;  %v1118_v21 = vadd.f32 %v1041_v16, %v1040_v14 }
 0x204   :  { %v858_v22 = vadd.f32 %v857_v20, %v1843_v51  ;;  %v859_v23 = vpop.f32.mrb[21].mxu1 }
 0x205   :  { %v860_v24 = vadd.f32 %v859_v23, %v1846_v62  ;;  %v861_v25 = vpop.f32.mrb[22].mxu1  ;;  %1119 = vadd.xlane.f32.xlu0 %v1118_v21  ;;  %v1121_v26 = vadd.f32 %v1043_v19, %v1042_v18 }
 0x206   :  { %v968_v27 = vmax.f32 %v858_v22, 0.0  ;;  %v862_v28 = vadd.f32 %v861_v25, %v1843_v51  ;;  %v863_v29 = vpop.f32.mrb[23].mxu1 }
 0x207   :  { %v969_v30 = vmax.f32 %v860_v24, 0.0  ;;  %v864_v31 = vadd.f32 %v863_v29, %v1846_v62 }
 0x208   :  { %v970_v32 = vmax.f32 %v862_v28, 0.0  ;;  %v1044_v33 = vmul.f32 %v1853_v55, %v968_v27 }
 0x209   :  { %v971_v34 = vmax.f32 %v864_v31, 0.0  ;;  %1122 = vadd.xlane.f32.xlu0 %v1121_v26  ;;  %v1045_v35 = vmul.f32 %v1857_v0, %v969_v30 }
 0x20a   :  { %v1046_v36 = vmul.f32 %v1853_v55, %v970_v32 }
 0x20b   :  { %v1047_v37 = vmul.f32 %v1857_v0, %v971_v34  ;;  %v867_v38 = vpop.f32.mrb[24].mxu1  ;;  %v1124_v39 = vadd.f32 %v1045_v35, %v1044_v33 }
 0x20c   :  { %v868_v40 = vadd.f32 %v867_v38, %v1843_v51  ;;  %v869_v41 = vpop.f32.mrb[25].mxu1 }
 0x20d   :  { %v870_v42 = vadd.f32 %v869_v41, %v1846_v62  ;;  %v871_v43 = vpop.f32.mrb[26].mxu1  ;;  %1125 = vadd.xlane.f32.xlu1 %v1124_v39  ;;  %v1127_v44 = vadd.f32 %v1047_v37, %v1046_v36 }
 0x20e   :  { %v972_v45 = vmax.f32 %v868_v40, 0.0  ;;  %v872_v46 = vadd.f32 %v871_v43, %v1843_v51  ;;  %v873_v47 = vpop.f32.mrb[27].mxu1 }
 0x20f   :  { %v973_v48 = vmax.f32 %v870_v42, 0.0  ;;  %v874_v49 = vadd.f32 %v873_v47, %v1846_v62 }
 0x210   :  { %v1048_v50 = vmul.f32 %v1853_v55, %v972_v45  ;;  %v974_v63 = vmax.f32 %v872_v46, 0.0 }
 0x211   :  { %v1049_v52 = vmul.f32 %v1857_v0, %v973_v48  ;;  %v975_v53 = vmax.f32 %v874_v49, 0.0  ;;  %1128 = vadd.xlane.f32.xlu1 %v1127_v44 }
 0x212   :  { %v1050_v54 = vmul.f32 %v1853_v55, %v974_v63 }
 0x213   :  { %v1051_v56 = vmul.f32 %v1857_v0, %v975_v53  ;;  %v877_v60 = vpop.f32.mrb[28].mxu1  ;;  %v1130_v1 = vadd.f32 %v1049_v52, %v1048_v50 }
 0x214   :  { %v878_v2 = vadd.f32 %v877_v60, %v1843_v51  ;;  %v879_v3 = vpop.f32.mrb[29].mxu1 }
 0x215   :  { %v880_v4 = vadd.f32 %v879_v3, %v1846_v62  ;;  %v881_v5 = vpop.f32.mrb[30].mxu1  ;;  %1131 = vadd.xlane.f32.xlu1 %v1130_v1  ;;  %v1133_v6 = vadd.f32 %v1051_v56, %v1050_v54 }
 0x216   :  { %v976_v7 = vmax.f32 %v878_v2, 0.0  ;;  %v882_v8 = vadd.f32 %v881_v5, %v1843_v51  ;;  %v883_v59 = vpop.f32.mrb[31].mxu1 }
 0x217   :  { %v977_v9 = vmax.f32 %v880_v4, 0.0  ;;  %v884_v10 = vadd.f32 %v883_v59, %v1846_v62 }
 0x218   :  { %v1052_v11 = vmul.f32 %v1853_v55, %v976_v7  ;;  %v978_v61 = vmax.f32 %v882_v8, 0.0 }
 0x219   :  { %v1053_v12 = vmul.f32 %v1857_v0, %v977_v9  ;;  %v979_v13 = vmax.f32 %v884_v10, 0.0  ;;  %1134 = vadd.xlane.f32.xlu1 %v1133_v6 }
 0x21a   :  { %v1054_v14 = vmul.f32 %v1853_v55, %v978_v61 }
 0x21b   :  { %v1055_v15 = vmul.f32 %v1857_v0, %v979_v13  ;;  %v887_v16 = vpop.f32.mrb[32].mxu1  ;;  %v1136_v17 = vadd.f32 %v1053_v12, %v1052_v11 }
 0x21c   :  { %v888_v18 = vadd.f32 %v887_v16, %v1843_v51  ;;  %v889_v19 = vpop.f32.mrb[33].mxu1 }
 0x21d   :  { %v890_v20 = vadd.f32 %v889_v19, %v1846_v62  ;;  %v891_v21 = vpop.f32.mrb[34].mxu1  ;;  %1137 = vadd.xlane.f32.xlu1 %v1136_v17  ;;  %v1139_v22 = vadd.f32 %v1055_v15, %v1054_v14 }
 0x21e   :  { %v980_v23 = vmax.f32 %v888_v18, 0.0  ;;  %v892_v24 = vadd.f32 %v891_v21, %v1843_v51  ;;  %v893_v25 = vpop.f32.mrb[35].mxu1 }
 0x21f   :  { %v981_v26 = vmax.f32 %v890_v20, 0.0  ;;  %v894_v27 = vadd.f32 %v893_v25, %v1846_v62 }
 0x220   :  { %v1056_v28 = vmul.f32 %v1853_v55, %v980_v23  ;;  %v982_v29 = vmax.f32 %v892_v24, 0.0 }
 0x221   :  { %v1057_v30 = vmul.f32 %v1857_v0, %v981_v26  ;;  %v983_v31 = vmax.f32 %v894_v27, 0.0  ;;  %1140 = vadd.xlane.f32.xlu1 %v1139_v22 }
 0x222   :  { %v1058_v32 = vmul.f32 %v1853_v55, %v982_v29 }
 0x223   :  { %v1059_v33 = vmul.f32 %v1857_v0, %v983_v31  ;;  %v897_v34 = vpop.f32.mrb[36].mxu1  ;;  %v1142_v35 = vadd.f32 %v1057_v30, %v1056_v28 }
 0x224   :  { %v898_v36 = vadd.f32 %v897_v34, %v1843_v51  ;;  %v899_v37 = vpop.f32.mrb[37].mxu1 }
 0x225   :  { %v900_v38 = vadd.f32 %v899_v37, %v1846_v62  ;;  %v901_v39 = vpop.f32.mrb[38].mxu1  ;;  %1143 = vadd.xlane.f32.xlu1 %v1142_v35  ;;  %v1145_v40 = vadd.f32 %v1059_v33, %v1058_v32 }
 0x226   :  { %v984_v41 = vmax.f32 %v898_v36, 0.0  ;;  %v902_v42 = vadd.f32 %v901_v39, %v1843_v51  ;;  %v903_v43 = vpop.f32.mrb[39].mxu1 }
 0x227   :  { %v985_v44 = vmax.f32 %v900_v38, 0.0  ;;  %v904_v45 = vadd.f32 %v903_v43, %v1846_v62 }
 0x228   :  { %v1060_v46 = vmul.f32 %v1853_v55, %v984_v41  ;;  %v986_v47 = vmax.f32 %v902_v42, 0.0 }
 0x229   :  { %v1061_v48 = vmul.f32 %v1857_v0, %v985_v44  ;;  %v987_v49 = vmax.f32 %v904_v45, 0.0  ;;  %1146 = vadd.xlane.f32.xlu1 %v1145_v40 }
 0x22a   :  { %v1062_v50 = vmul.f32 %v1853_v55, %v986_v47 }
 0x22b   :  { %v1063_v63 = vmul.f32 %v1857_v0, %v987_v49  ;;  %v907_v52 = vpop.f32.mrb[40].mxu1  ;;  %v1148_v53 = vadd.f32 %v1061_v48, %v1060_v46 }
 0x22c   :  { %v908_v54 = vadd.f32 %v907_v52, %v1843_v51  ;;  %v909_v56 = vpop.f32.mrb[41].mxu1 }
 0x22d   :  { %v910_v60 = vadd.f32 %v909_v56, %v1846_v62  ;;  %v911_v1 = vpop.f32.mrb[42].mxu1  ;;  %1149 = vadd.xlane.f32.xlu1 %v1148_v53  ;;  %v1151_v2 = vadd.f32 %v1063_v63, %v1062_v50 }
 0x22e   :  { %v988_v3 = vmax.f32 %v908_v54, 0.0  ;;  %v912_v4 = vadd.f32 %v911_v1, %v1843_v51  ;;  %v913_v5 = vpop.f32.mrb[43].mxu1 }
 0x22f   :  { %v989_v6 = vmax.f32 %v910_v60, 0.0  ;;  %v914_v7 = vadd.f32 %v913_v5, %v1846_v62 }
 0x230   :  { %v1064_v8 = vmul.f32 %v1853_v55, %v988_v3  ;;  %v990_v59 = vmax.f32 %v912_v4, 0.0 }
 0x231   :  { %v1065_v9 = vmul.f32 %v1857_v0, %v989_v6  ;;  %v991_v10 = vmax.f32 %v914_v7, 0.0  ;;  %1152 = vadd.xlane.f32.xlu1 %v1151_v2 }
 0x232   :  { %v1066_v11 = vmul.f32 %v1853_v55, %v990_v59 }
 0x233   :  { %v1067_v61 = vmul.f32 %v1857_v0, %v991_v10  ;;  %v917_v12 = vpop.f32.mrb[44].mxu1  ;;  %v1154_v13 = vadd.f32 %v1065_v9, %v1064_v8 }
 0x234   :  { %v918_v14 = vadd.f32 %v917_v12, %v1843_v51  ;;  %v919_v15 = vpop.f32.mrb[45].mxu1 }
 0x235   :  { %v920_v16 = vadd.f32 %v919_v15, %v1846_v62  ;;  %v921_v17 = vpop.f32.mrb[46].mxu1  ;;  %1155 = vadd.xlane.f32.xlu1 %v1154_v13  ;;  %v1157_v18 = vadd.f32 %v1067_v61, %v1066_v11 }
 0x236   :  { %v992_v19 = vmax.f32 %v918_v14, 0.0  ;;  %v922_v20 = vadd.f32 %v921_v17, %v1843_v51  ;;  %v923_v21 = vpop.f32.mrb[47].mxu1 }
 0x237   :  { %v993_v22 = vmax.f32 %v920_v16, 0.0  ;;  %v924_v23 = vadd.f32 %v923_v21, %v1846_v62 }
 0x238   :  { %v1068_v24 = vmul.f32 %v1853_v55, %v992_v19  ;;  %v994_v25 = vmax.f32 %v922_v20, 0.0 }
 0x239   :  { %v1069_v26 = vmul.f32 %v1857_v0, %v993_v22  ;;  %v995_v27 = vmax.f32 %v924_v23, 0.0  ;;  %1158 = vadd.xlane.f32.xlu1 %v1157_v18 }
 0x23a   :  { %v1070_v28 = vmul.f32 %v1853_v55, %v994_v25 }
 0x23b   :  { %v1071_v29 = vmul.f32 %v1857_v0, %v995_v27  ;;  %v927_v30 = vpop.f32.mrb[48].mxu1  ;;  %v1160_v31 = vadd.f32 %v1069_v26, %v1068_v24 }
 0x23c   :  { %v928_v32 = vadd.f32 %v927_v30, %v1843_v51  ;;  %v929_v33 = vpop.f32.mrb[49].mxu1 }
 0x23d   :  { %v930_v34 = vadd.f32 %v929_v33, %v1846_v62  ;;  %v931_v35 = vpop.f32.mrb[50].mxu1  ;;  %1161 = vadd.xlane.f32.xlu1 %v1160_v31  ;;  %v1163_v36 = vadd.f32 %v1071_v29, %v1070_v28 }
 0x23e   :  { %v996_v37 = vmax.f32 %v928_v32, 0.0  ;;  %v932_v38 = vadd.f32 %v931_v35, %v1843_v51  ;;  %v933_v39 = vpop.f32.mrb[51].mxu1  ;;  %v1988_v51 = vstv %s2042_s6  ;;  %s1516_s6 = smov [#allocation3]  }
 0x23f   :  { %v997_v40 = vmax.f32 %v930_v34, 0.0  ;;  %v934_v41 = vadd.f32 %v933_v39, %v1846_v62  ;;  %s1299_s20 = sshll.u32 %s1516_s6, 4  ;;  %s1300_s20 = int_to_ptr.vmem [resolvable:$true] %s1299_s20 }
 0x240   :  { %v1072_v42 = vmul.f32 %v1853_v55, %v996_v37  ;;  %v998_v43 = vmax.f32 %v932_v38, 0.0  ;;  %s1490_s21 = scalar_lea.vmem %s1300_s20, 32  ;;  %p1495_p1 = scmp.lt.s32.totalorder %s1300_s20, %s1300_s20 }
 0x241   :  { %v1073_v44 = vmul.f32 %v1857_v0, %v997_v40  ;;  %v999_v45 = vmax.f32 %v934_v41, 0.0  ;;  %1164 = vadd.xlane.f32.xlu1 %v1163_v36  ;;  %p1491_p0 = scmp.ne.s32.totalorder %s1300_s20, %s1490_s21  ;;  %p1496_p2 = scmp.lt.s32.totalorder %s1490_s21, %s1490_s21 }
 0x242   :  { %v1074_v46 = vmul.f32 %v1853_v55, %v998_v43 }
 0x243   :  { %v1075_v47 = vmul.f32 %v1857_v0, %v999_v45  ;;  %v1166_v48 = vadd.f32 %v1073_v44, %v1072_v42  ;;  %p1497_p3 = por %p1496_p2, %p1495_p1 }
 0x245   :  { %1167 = vadd.xlane.f32.xlu1 %v1166_v48  ;;  %v1169_v49 = vadd.f32 %v1075_v47, %v1074_v46  ;;  %p1498_p4 = pnand %p1497_p3, %p1491_p0 }
 0x249   :  { %1170 = vadd.xlane.f32.xlu1 %v1169_v49 }
 0x25a   :  { %v1078_v62 = vpop.xlane.xlu0 %1077 }
 0x25b   :  { %v1174_v50 = vadd.f32 %v1988_v51, %v1078_v62 }
 0x25d   :  { %1206 = vxpose.xlu0.b32.start [1/16] (narrow) %v1174_v50, 8 }
 0x25e   :  { %v1081_v63 = vpop.xlane.xlu0 %1080 }
 0x25f   :  { %v1175_v52 = vadd.f32 %v1988_v51, %v1081_v63 }
 0x261   :  { %1207 = vxpose.xlu0.b32.cont [2/16] (narrow) %v1175_v52, 8  ;;  %v1515_v52 = vmov 1966171168  }
 0x262   :  { %v1084_v55 = vpop.xlane.xlu0 %1083 }
 0x263   :  { %v1176_v0 = vadd.f32 %v1988_v51, %v1084_v55  ;;  %v1274_v55 = vunpack.c.l.s4 %v1515_v52 }
 0x265   :  { %1208 = vxpose.xlu0.b32.cont [3/16] (narrow) %v1176_v0, 8  ;;  %v1275_v0 = vunpack.c.0.s8 %v1274_v55 }
 0x266   :  { %v1087_v53 = vpop.xlane.xlu0 %1086 }
 0x267   :  { %v1177_v54 = vadd.f32 %v1988_v51, %v1087_v53 }
 0x269   :  { %1209 = vxpose.xlu0.b32.cont [4/16] (narrow) %v1177_v54, 8  ;;  %v1278_v54 = vsub.s32 %v1275_v0, %v1758_v58 }
 0x26a   :  { %v1090_v56 = vpop.xlane.xlu0 %1089 }
 0x26b   :  { %v1178_v60 = vadd.f32 %v1988_v51, %v1090_v56 }
 0x26d   :  { %1210 = vxpose.xlu0.b32.cont [5/16] (narrow) %v1178_v60, 8 }
 0x26e   :  { %v1093_v1 = vpop.xlane.xlu0 %1092 }
 0x26f   :  { %v1179_v2 = vadd.f32 %v1988_v51, %v1093_v1 }
 0x271   :  { %1211 = vxpose.xlu0.b32.cont [6/16] (narrow) %v1179_v2, 8 }
 0x272   :  { %v1096_v3 = vpop.xlane.xlu0 %1095 }
 0x273   :  { %v1180_v4 = vadd.f32 %v1988_v51, %v1096_v3 }
 0x275   :  { %1212 = vxpose.xlu0.b32.cont [7/16] (narrow) %v1180_v4, 8 }
 0x276   :  { %v1099_v5 = vpop.xlane.xlu0 %1098 }
 0x277   :  { %v1181_v6 = vadd.f32 %v1988_v51, %v1099_v5 }
 0x279   :  { %1213 = vxpose.xlu0.b32.cont [8/16] (narrow) %v1181_v6, 8 }
 0x27a   :  { %v1102_v7 = vpop.xlane.xlu0 %1101 }
 0x27b   :  { %v1182_v8 = vadd.f32 %v1988_v51, %v1102_v7 }
 0x27d   :  { %1214 = vxpose.xlu0.b32.cont [9/16] (narrow) %v1182_v8, 8 }
 0x27e   :  { %v1105_v59 = vpop.xlane.xlu0 %1104 }
 0x27f   :  { %v1183_v9 = vadd.f32 %v1988_v51, %v1105_v59 }
 0x281   :  { %1215 = vxpose.xlu0.b32.cont [10/16] (narrow) %v1183_v9, 8 }
 0x282   :  { %v1108_v10 = vpop.xlane.xlu0 %1107 }
 0x283   :  { %v1184_v11 = vadd.f32 %v1988_v51, %v1108_v10 }
 0x285   :  { %1216 = vxpose.xlu0.b32.cont [11/16] (narrow) %v1184_v11, 8 }
 0x286   :  { %v1111_v61 = vpop.xlane.xlu0 %1110 }
 0x287   :  { %v1185_v12 = vadd.f32 %v1988_v51, %v1111_v61 }
 0x289   :  { %1217 = vxpose.xlu0.b32.cont [12/16] (narrow) %v1185_v12, 8 }
 0x28a   :  { %v1114_v13 = vpop.xlane.xlu0 %1113 }
 0x28b   :  { %v1186_v14 = vadd.f32 %v1988_v51, %v1114_v13 }
 0x28d   :  { %1218 = vxpose.xlu0.b32.cont [13/16] (narrow) %v1186_v14, 8 }
 0x28e   :  { %v1117_v15 = vpop.xlane.xlu0 %1116 }
 0x28f   :  { %v1187_v16 = vadd.f32 %v1988_v51, %v1117_v15 }
 0x291   :  { %1219 = vxpose.xlu0.b32.cont [14/16] (narrow) %v1187_v16, 8 }
 0x292   :  { %v1120_v17 = vpop.xlane.xlu0 %1119 }
 0x293   :  { %v1188_v18 = vadd.f32 %v1988_v51, %v1120_v17 }
 0x295   :  { %1220 = vxpose.xlu0.b32.cont [15/16] (narrow) %v1188_v18, 8 }
 0x296   :  { %v1123_v19 = vpop.xlane.xlu0 %1122 }
 0x297   :  { %v1189_v20 = vadd.f32 %v1988_v51, %v1123_v19 }
 0x299   :  { %1221 = vxpose.xlu0.b32.end [16/16] (narrow) %v1189_v20, 8 }
 0x29a   :  { %v1126_v21 = vpop.xlane.xlu1 %1125 }
 0x29b   :  { %v1190_v22 = vadd.f32 %v1988_v51, %v1126_v21 }
 0x29d   :  { %1238 = vxpose.xlu1.b32.start [1/16] (narrow) %v1190_v22, 8 }
 0x29e   :  { %v1129_v23 = vpop.xlane.xlu1 %1128 }
 0x29f   :  { %v1191_v24 = vadd.f32 %v1988_v51, %v1129_v23 }
 0x2a1   :  { %1239 = vxpose.xlu1.b32.cont [2/16] (narrow) %v1191_v24, 8 }
 0x2a2   :  { %v1132_v25 = vpop.xlane.xlu1 %1131 }
 0x2a3   :  { %v1192_v26 = vadd.f32 %v1988_v51, %v1132_v25 }
 0x2a5   :  { %1240 = vxpose.xlu1.b32.cont [3/16] (narrow) %v1192_v26, 8 }
 0x2a6   :  { %v1135_v27 = vpop.xlane.xlu1 %1134 }
 0x2a7   :  { %v1193_v28 = vadd.f32 %v1988_v51, %v1135_v27 }
 0x2a9   :  { %1241 = vxpose.xlu1.b32.cont [4/16] (narrow) %v1193_v28, 8 }
 0x2aa   :  { %v1138_v29 = vpop.xlane.xlu1 %1137 }
 0x2ab   :  { %v1194_v30 = vadd.f32 %v1988_v51, %v1138_v29 }
 0x2ad   :  { %1242 = vxpose.xlu1.b32.cont [5/16] (narrow) %v1194_v30, 8 }
 0x2ae   :  { %v1141_v31 = vpop.xlane.xlu1 %1140 }
 0x2af   :  { %v1195_v32 = vadd.f32 %v1988_v51, %v1141_v31 }
 0x2b1   :  { %1243 = vxpose.xlu1.b32.cont [6/16] (narrow) %v1195_v32, 8 }
 0x2b2   :  { %v1144_v33 = vpop.xlane.xlu1 %1143 }
 0x2b3   :  { %v1196_v34 = vadd.f32 %v1988_v51, %v1144_v33 }
 0x2b5   :  { %1244 = vxpose.xlu1.b32.cont [7/16] (narrow) %v1196_v34, 8 }
 0x2b6   :  { %v1147_v35 = vpop.xlane.xlu1 %1146 }
 0x2b7   :  { %v1197_v36 = vadd.f32 %v1988_v51, %v1147_v35 }
 0x2b9   :  { %1245 = vxpose.xlu1.b32.cont [8/16] (narrow) %v1197_v36, 8 }
 0x2ba   :  { %v1150_v37 = vpop.xlane.xlu1 %1149 }
 0x2bb   :  { %v1198_v38 = vadd.f32 %v1988_v51, %v1150_v37 }
 0x2bd   :  { %1246 = vxpose.xlu1.b32.cont [9/16] (narrow) %v1198_v38, 8 }
 0x2be   :  { %v1153_v39 = vpop.xlane.xlu1 %1152 }
 0x2bf   :  { %v1199_v40 = vadd.f32 %v1988_v51, %v1153_v39 }
 0x2c1   :  { %1247 = vxpose.xlu1.b32.cont [10/16] (narrow) %v1199_v40, 8 }
 0x2c2   :  { %v1156_v41 = vpop.xlane.xlu1 %1155 }
 0x2c3   :  { %v1200_v42 = vadd.f32 %v1988_v51, %v1156_v41 }
 0x2c5   :  { %1248 = vxpose.xlu1.b32.cont [11/16] (narrow) %v1200_v42, 8 }
 0x2c6   :  { %v1159_v43 = vpop.xlane.xlu1 %1158 }
 0x2c7   :  { %v1201_v44 = vadd.f32 %v1988_v51, %v1159_v43 }
 0x2c9   :  { %1249 = vxpose.xlu1.b32.cont [12/16] (narrow) %v1201_v44, 8 }
 0x2ca   :  { %v1162_v45 = vpop.xlane.xlu1 %1161 }
 0x2cb   :  { %v1202_v46 = vadd.f32 %v1988_v51, %v1162_v45 }
 0x2cd   :  { %1250 = vxpose.xlu1.b32.cont [13/16] (narrow) %v1202_v46, 8 }
 0x2ce   :  { %v1165_v47 = vpop.xlane.xlu1 %1164 }
 0x2cf   :  { %v1203_v48 = vadd.f32 %v1988_v51, %v1165_v47 }
 0x2d1   :  { %1251 = vxpose.xlu1.b32.cont [14/16] (narrow) %v1203_v48, 8 }
 0x2d2   :  { %v1168_v49 = vpop.xlane.xlu1 %1167 }
 0x2d3   :  { %v1204_v62 = vadd.f32 %v1988_v51, %v1168_v49 }
 0x2d5   :  { %1252 = vxpose.xlu1.b32.cont [15/16] (narrow) %v1204_v62, 8 }
 0x2d6   :  { %v1171_v50 = vpop.xlane.xlu1 %1170 }
 0x2d7   :  { %v1205_v63 = vadd.f32 %v1988_v51, %v1171_v50 }
 0x2d9   :  { %1253 = vxpose.xlu1.b32.end [16/16] (narrow) %v1205_v63, 8 }
 0x2dd   :  { %v1222_v53 = vpop.trf.xlu0 }
 0x31d   :  { %v1254_v56 = vpop.trf.xlu1 }
 0x31e   :  { %v1272_v60 = vcombine.low %v1222_v53, %v1254_v56 }
 0x320   :  { %v1279_v1 = vrot.slane %v1272_v60, %v1278_v54 }
 0x322   :  { %v1286_v2 = vrot.slane %v1279_v1, %v1278_v54 }
 0x324   :  { %1292 = vst.msk [vmem:[#allocation3] sm:$0x3] %vm1290_vm1, %v1286_v2 }
 0x325   :  { %1501 = shalt.err (!%p1498_p4)
}
 0x326   :  { %s1502_s23 = scalar_lea.hbm %s2043_s7, 32 }
 0x327   :  { %p1503_p5 = scmp.ne.s32.totalorder %s2043_s7, %s1502_s23  ;;  %p1506_p6 = scmp.lt.u32.totalorder %s1502_s23, %s2043_s7 }
 0x329   :  { %p1508_p7 = pnand %p1506_p6, %p1503_p5 }
 0x32b   :  { %1511 = shalt.err (!%p1508_p7)
}
 0x32c   :  { %1302 = dma.vmem_to_hbm [thread:$0]  %s1300_s20, 32, %s2043_s7, [#allocation4]  }
 0x32d   :  { %1512 = dma.done.wait [#allocation4], 32  }
 0x32e   :  { %1513 = vsyncadd [#allocation4], 4294967264 }
 0x32f   :  { %1306 = vsyncpa [#allocation4], 1 }

</bundles_post_ra>
